<compile_context>
chip_gen: v6e
topology: v6e:2x2x1
jax: 0.10.0
libtpu: 0.0.40
codegen_flags: <defaults>
</compile_context>

<pallas_src>
import functools

import jax
import jax.numpy as jnp
from jax import lax
from jax.experimental import pallas as pl
from jax.experimental.pallas import tpu as pltpu

HIDDEN = 64
FC1_DIM = 181


def _round_up(n, m):
    return ((n + m - 1) // m) * m


def lstm_head_kernel(x_ref,      # (T*Bp, Cp)  f32, time-major, batch/channel padded
                     wih0_ref,   # (Cp, 4H)    f32
                     b0_ref,     # (1, 4H)     f32, b_ih0 + b_hh0
                     whh0_ref,   # (2H, 4H)    bf16, rows [H:2H) zero (consumes [h|c])
                     w1_ref,     # (4H, 4H)    bf16, [wih1 ; 0 ; whh1 ; 0] (consumes [h0|c0|h1|c1])
                     b1_ref,     # (1, 4H)     f32, b_ih1 + b_hh1
                     whead_ref,  # (2H, NCp)   f32, fused wfc1@wcls, rows [H:2H) zero
                     bhead_ref,  # (1, NCp)    f32
                     out_ref,    # (Bp, NCp)   f32
                     ):
    H = HIDDEN
    G = 2 * H                       # packed lane-group width (128)
    Bp = out_ref.shape[0]
    T = x_ref.shape[0] // Bp

    # Hoisted per-lane constants (broadcasts aren't CSE'd -> keep out of the loop).
    lane = lax.broadcasted_iota(jnp.int32, (Bp, G), 1)
    lo_half = lane < H              # lanes [0, H)
    half = jnp.float32(0.5)
    one = jnp.float32(1.0)
    zero = jnp.float32(0.0)
    # Single-tanh activation of the [g | o] group:
    #   g lanes: tanh(x)              -> pre 1.0, post 1.0, bias 0.0
    #   o lanes: sigmoid(x)=.5tanh(.5x)+.5 -> pre 0.5, post 0.5, bias 0.5
    bg_pre = jnp.where(lo_half, one, half)
    bg_post = bg_pre
    bg_bias = jnp.where(lo_half, zero, half)

    whh0 = whh0_ref[...]            # bf16, resident across all steps
    w1 = w1_ref[...]                # bf16, resident across all steps
    b0 = b0_ref[...]
    b1 = b1_ref[...]

    def activate(gates, s):
        # s = [h | c] (Bp, 2H) f32; gates = [i|f|g|o] pre-activations (Bp, 4H) f32.
        a = gates[:, 0:G]                 # [i_pre | f_pre]   (128-aligned slice)
        bg = gates[:, G:2 * G]            # [g_pre | o_pre]   (128-aligned slice)
        a_act = half * jnp.tanh(half * a) + half            # sigmoid -> [i | f]
        b_act = bg_post * jnp.tanh(bg_pre * bg) + bg_bias   # [g | o]
        ig_fo = a_act * b_act             # [i*g | f*o]
        ih_fc = a_act * s                 # [i*h | f*c]
        c_pack = ih_fc + pltpu.roll(ig_fo, H, 1)   # [junk | f*c + i*g] = [junk | c_new]
        h_pack = b_act * jnp.tanh(c_pack)          # [junk | o*tanh(c_new)] = [junk | h_new]
        # repack -> [h_new | c_new]
        return jnp.where(lo_half, pltpu.roll(h_pack, H, 1), c_pack)

    # Layer-0 input projection hoisted out of the recurrence: one matmul for all T.
    g0 = (jnp.dot(x_ref[...], wih0_ref[...], preferred_element_type=jnp.float32)
          + b0)                                           # (T*Bp, 4H) f32

    # Interleaved (wavefront) recurrence over both layers, fully unrolled (T static).
    s0 = jnp.zeros((Bp, G), jnp.float32)                  # [h0 | c0]
    s1 = jnp.zeros((Bp, G), jnp.float32)                  # [h1 | c1]
    for t in range(T):
        gates0 = g0[t * Bp:(t + 1) * Bp, :] + jnp.dot(
            s0.astype(jnp.bfloat16), whh0, preferred_element_type=jnp.float32)
        s0 = activate(gates0, s0)
        # Layer-1 input + recurrent projection in ONE dot: [h0|c0|h1|c1] @ [wih1;0;whh1;0]
        s_cat = jnp.concatenate([s0, s1], axis=1).astype(jnp.bfloat16)   # (Bp, 4H)
        gates1 = b1 + jnp.dot(s_cat, w1, preferred_element_type=jnp.float32)
        s1 = activate(gates1, s1)

    # Fused head: classifier(fc1(h1_last)); dropout is identity at inference.
    out_ref[...] = (jnp.dot(s1, whead_ref[...], preferred_element_type=jnp.float32)
                    + bhead_ref[...])


def prepare_params(params, n_channels, n_classes):
    """One-time weight prep: pad, pack, fuse head, cast recurrent weights to bf16."""
    H = HIDDEN
    Cp = _round_up(n_channels, 8)
    NCp = _round_up(n_classes, 128)                       # lane-dense output store
    zH = jnp.zeros((H, 4 * H), jnp.float32)

    wih0 = jnp.pad(params["wih0"], ((0, Cp - n_channels), (0, 0)))        # (Cp, 4H) f32
    # recurrent weights consume the packed [h | c] state: c-rows are zero
    whh0 = jnp.concatenate([params["whh0"], zH], axis=0).astype(jnp.bfloat16)   # (2H, 4H)
    w1 = jnp.concatenate([params["wih1"], zH, params["whh1"], zH],
                         axis=0).astype(jnp.bfloat16)                           # (4H, 4H)
    # fc1 + classifier collapse (no nonlinearity between them at inference)
    w_head = params["wfc1"] @ params["wcls"]                              # (H, NC)
    b_head = params["bfc1"] @ params["wcls"] + params["bcls"]             # (1, NC)
    w_head = jnp.pad(w_head, ((0, H), (0, NCp - n_classes)))              # (2H, NCp) f32
    b_head = jnp.pad(b_head, ((0, 0), (0, NCp - n_classes)))              # (1, NCp)  f32

    return {"wih0": wih0, "b0": params["b0"], "whh0": whh0,
            "w1": w1, "b1": params["b1"],
            "w_head": w_head, "b_head": b_head}


def _forward_impl(x, prepped, n_classes):
    """x: (B, T, n_channels) f32 -> (B, n_classes) f32."""
    B, T, C = x.shape
    Bp = _round_up(B, 8)                     # f32 sublane multiple
    Cp = prepped["wih0"].shape[0]
    NCp = prepped["w_head"].shape[1]

    # time-major, batch/channel zero-padded, flattened to (T*Bp, Cp)
    x_tm = jnp.transpose(x, (1, 0, 2))
    x_tm = jnp.pad(x_tm, ((0, 0), (0, Bp - B), (0, Cp - C)))
    x2d = x_tm.reshape(T * Bp, Cp)

    vmem = pl.BlockSpec(memory_space=pltpu.MemorySpace.VMEM)
    out = pl.pallas_call(
        lstm_head_kernel,
        out_shape=jax.ShapeDtypeStruct((Bp, NCp), jnp.float32),
        in_specs=[vmem] * 8,
        out_specs=vmem,
    )(x2d, prepped["wih0"], prepped["b0"], prepped["whh0"],
      prepped["w1"], prepped["b1"], prepped["w_head"], prepped["b_head"])
    return out[:B, :n_classes]


lstm_forward = jax.jit(_forward_impl, static_argnums=(2,))


def init_params(key, n_channels, n_classes):
    """Deterministic init matching the PyTorch module's parameter shapes.

    PyTorch stores weight_ih/weight_hh as (4H, in); we store the transpose
    (in, 4H) and fold bias_ih + bias_hh into one (1, 4H) bias per layer.
    Gate column order is PyTorch's [i, f, g, o].
    """
    H = HIDDEN
    k_lstm = 1.0 / jnp.sqrt(H)
    ks = jax.random.split(key, 12)

    def u(k, shape, bound):
        return jax.random.uniform(k, shape, jnp.float32, -bound, bound)

    return {
        "wih0": u(ks[0], (n_channels, 4 * H), k_lstm),
        "whh0": u(ks[1], (H, 4 * H), k_lstm),
        "b0":   u(ks[2], (1, 4 * H), k_lstm) + u(ks[3], (1, 4 * H), k_lstm),
        "wih1": u(ks[4], (H, 4 * H), k_lstm),
        "whh1": u(ks[5], (H, 4 * H), k_lstm),
        "b1":   u(ks[6], (1, 4 * H), k_lstm) + u(ks[7], (1, 4 * H), k_lstm),
        "wfc1": u(ks[8], (H, FC1_DIM), 1.0 / jnp.sqrt(H)),
        "bfc1": u(ks[9], (1, FC1_DIM), 1.0 / jnp.sqrt(H)),
        "wcls": u(ks[10], (FC1_DIM, n_classes), 1.0 / jnp.sqrt(FC1_DIM)),
        "bcls": u(ks[11], (1, n_classes), 1.0 / jnp.sqrt(FC1_DIM)),
    }


def reference_forward(x, params):
    """Pure-JAX f32 reference of the original (unfused, unpadded) module math."""
    H = HIDDEN
    B, T, C = x.shape
    hp = lax.Precision.HIGHEST

    def cell(xt, h, c, wih, whh, b):
        gates = jnp.dot(xt, wih, precision=hp) + jnp.dot(h, whh, precision=hp) + b
        i = jax.nn.sigmoid(gates[:, 0:H])
        f = jax.nn.sigmoid(gates[:, H:2 * H])
        g = jnp.tanh(gates[:, 2 * H:3 * H])
        o = jax.nn.sigmoid(gates[:, 3 * H:4 * H])
        c_new = f * c + i * g
        return o * jnp.tanh(c_new), c_new

    def step(carry, xt):
        h0, c0, h1, c1 = carry
        h0, c0 = cell(xt, h0, c0, params["wih0"], params["whh0"], params["b0"])
        h1, c1 = cell(h0, h1, c1, params["wih1"], params["whh1"], params["b1"])
        return (h0, c0, h1, c1), None

    z = jnp.zeros((B, H), jnp.float32)
    (_, _, h1, _), _ = lax.scan(step, (z, z, z, z), jnp.transpose(x, (1, 0, 2)))
    y = jnp.dot(h1, params["wfc1"], precision=hp) + params["bfc1"]
    return jnp.dot(y, params["wcls"], precision=hp) + params["bcls"]


if __name__ == "__main__":
    B, T, C = 2, 8, 4          # batch, seq_len, n_channels
    n_classes = 6

    key = jax.random.PRNGKey(0)
    k_x, k_p = jax.random.split(key)
    x = jax.random.normal(k_x, (B, T, C), jnp.float32)
    params = init_params(k_p, C, n_classes)
    prepped = prepare_params(params, C, n_classes)

    out = jax.block_until_ready(lstm_forward(x, prepped, n_classes))

    ref = reference_forward(x, params)
    assert out.shape == (B, n_classes)
    # bf16 operands on the recurrent-path matmuls (f32 accumulate) -> tolerance
    # relaxed from the pure-f32 1e-3 to 1e-2.
    assert jnp.allclose(out, ref, atol=1e-2, rtol=1e-2), "mismatch vs reference"

    print("KERNEL_OK")
</pallas_src>

<mosaic_0001>
module attributes {stable_mosaic.version = 11 : i64} {
  func.func @lstm_head_kernel(%arg0: memref<64x8xf32, #tpu.memory_space<vmem>>, %arg1: memref<8x256xf32, #tpu.memory_space<vmem>>, %arg2: memref<1x256xf32, #tpu.memory_space<vmem>>, %arg3: memref<128x256xbf16, #tpu.memory_space<vmem>>, %arg4: memref<256x256xbf16, #tpu.memory_space<vmem>>, %arg5: memref<1x256xf32, #tpu.memory_space<vmem>>, %arg6: memref<128x128xf32, #tpu.memory_space<vmem>>, %arg7: memref<1x128xf32, #tpu.memory_space<vmem>>, %arg8: memref<8x128xf32, #tpu.memory_space<vmem>>) attributes {dimension_semantics = [], scalar_prefetch = 0 : i64, scratch_operands = 0 : i64, tpu.core_type = #tpu.core_type<tc>} {
    %0 = tpu.iota {dimensions = array<i32: 1>} : vector<8x128xi32>
    %c64_i32 = arith.constant 64 : i32
    %1 = vector.broadcast %c64_i32 : i32 to vector<8x128xi32>
    %2 = arith.cmpi slt, %0, %1 : vector<8x128xi32>
    %cst = arith.constant 1.000000e+00 : f32
    %cst_0 = arith.constant 5.000000e-01 : f32
    %3 = vector.broadcast %cst : f32 to vector<8x128xf32>
    %4 = vector.broadcast %cst_0 : f32 to vector<8x128xf32>
    %5 = arith.select %2, %3, %4 : vector<8x128xi1>, vector<8x128xf32>
    %cst_1 = arith.constant 0.000000e+00 : f32
    %cst_2 = arith.constant 5.000000e-01 : f32
    %6 = vector.broadcast %cst_1 : f32 to vector<8x128xf32>
    %7 = vector.broadcast %cst_2 : f32 to vector<8x128xf32>
    %8 = arith.select %2, %6, %7 : vector<8x128xi1>, vector<8x128xf32>
    %c0 = arith.constant 0 : index
    %c0_3 = arith.constant 0 : index
    %9 = vector.load %arg3[%c0, %c0_3] : memref<128x256xbf16, #tpu.memory_space<vmem>>, vector<128x256xbf16>
    %c0_4 = arith.constant 0 : index
    %c0_5 = arith.constant 0 : index
    %10 = vector.load %arg4[%c0_4, %c0_5] : memref<256x256xbf16, #tpu.memory_space<vmem>>, vector<256x256xbf16>
    %c0_6 = arith.constant 0 : index
    %c0_7 = arith.constant 0 : index
    %11 = vector.load %arg2[%c0_6, %c0_7] : memref<1x256xf32, #tpu.memory_space<vmem>>, vector<1x256xf32>
    %c0_8 = arith.constant 0 : index
    %c0_9 = arith.constant 0 : index
    %12 = vector.load %arg5[%c0_8, %c0_9] : memref<1x256xf32, #tpu.memory_space<vmem>>, vector<1x256xf32>
    %c0_10 = arith.constant 0 : index
    %c0_11 = arith.constant 0 : index
    %13 = vector.load %arg0[%c0_10, %c0_11] : memref<64x8xf32, #tpu.memory_space<vmem>>, vector<64x8xf32>
    %c0_12 = arith.constant 0 : index
    %c0_13 = arith.constant 0 : index
    %14 = vector.load %arg1[%c0_12, %c0_13] : memref<8x256xf32, #tpu.memory_space<vmem>>, vector<8x256xf32>
    %cst_14 = arith.constant dense<0.000000e+00> : vector<64x256xf32>
    %15 = tpu.matmul %13, %14, %cst_14 {dimension_numbers = #tpu.dot_dimension_numbers<[1], [0], [0], [1], [0, 0, 1, 1], [], []>} : vector<64x8xf32>, vector<8x256xf32>, vector<64x256xf32> -> vector<64x256xf32>
    %16 = vector.broadcast %11 : vector<1x256xf32> to vector<64x256xf32>
    %17 = arith.addf %15, %16 : vector<64x256xf32>
    %cst_15 = arith.constant 0.000000e+00 : f32
    %18 = vector.broadcast %cst_15 : f32 to vector<8x128xf32>
    %cst_16 = arith.constant 0.000000e+00 : f32
    %19 = vector.broadcast %cst_16 : f32 to vector<8x128xf32>
    %20 = vector.extract_strided_slice %17 {offsets = [0, 0], sizes = [8, 256], strides = [1, 1]} : vector<64x256xf32> to vector<8x256xf32>
    %21 = arith.truncf %18 : vector<8x128xf32> to vector<8x128xbf16>
    %cst_17 = arith.constant dense<0.000000e+00> : vector<8x256xf32>
    %22 = tpu.matmul %21, %9, %cst_17 {dimension_numbers = #tpu.dot_dimension_numbers<[1], [0], [0], [1], [0, 0, 1, 1], [], []>} : vector<8x128xbf16>, vector<128x256xbf16>, vector<8x256xf32> -> vector<8x256xf32>
    %23 = arith.addf %20, %22 : vector<8x256xf32>
    %24 = vector.extract_strided_slice %23 {offsets = [0, 0], sizes = [8, 128], strides = [1, 1]} : vector<8x256xf32> to vector<8x128xf32>
    %25 = vector.extract_strided_slice %23 {offsets = [0, 128], sizes = [8, 128], strides = [1, 1]} : vector<8x256xf32> to vector<8x128xf32>
    %cst_18 = arith.constant 5.000000e-01 : f32
    %26 = vector.broadcast %cst_18 : f32 to vector<8x128xf32>
    %27 = arith.mulf %26, %24 : vector<8x128xf32>
    %28 = math.tanh %27 : vector<8x128xf32>
    %cst_19 = arith.constant 5.000000e-01 : f32
    %29 = vector.broadcast %cst_19 : f32 to vector<8x128xf32>
    %30 = arith.mulf %29, %28 : vector<8x128xf32>
    %cst_20 = arith.constant 5.000000e-01 : f32
    %31 = vector.broadcast %cst_20 : f32 to vector<8x128xf32>
    %32 = arith.addf %30, %31 : vector<8x128xf32>
    %33 = arith.mulf %5, %25 : vector<8x128xf32>
    %34 = math.tanh %33 : vector<8x128xf32>
    %35 = arith.mulf %5, %34 : vector<8x128xf32>
    %36 = arith.addf %35, %8 : vector<8x128xf32>
    %37 = arith.mulf %32, %36 : vector<8x128xf32>
    %38 = arith.mulf %32, %18 : vector<8x128xf32>
    %c64_i32_21 = arith.constant 64 : i32
    %39 = tpu.dynamic_rotate %37 by %c64_i32_21 dim 1 : vector<8x128xf32>, i32 -> vector<8x128xf32>
    %40 = arith.addf %38, %39 : vector<8x128xf32>
    %41 = math.tanh %40 : vector<8x128xf32>
    %42 = arith.mulf %36, %41 : vector<8x128xf32>
    %c64_i32_22 = arith.constant 64 : i32
    %43 = tpu.dynamic_rotate %42 by %c64_i32_22 dim 1 : vector<8x128xf32>, i32 -> vector<8x128xf32>
    %44 = arith.select %2, %43, %40 : vector<8x128xi1>, vector<8x128xf32>
    %45 = tpu.concatenate %44, %19 in 1 : vector<8x128xf32>, vector<8x128xf32> -> vector<8x256xf32>
    %46 = arith.truncf %45 : vector<8x256xf32> to vector<8x256xbf16>
    %cst_23 = arith.constant dense<0.000000e+00> : vector<8x256xf32>
    %47 = tpu.matmul %46, %10, %cst_23 {dimension_numbers = #tpu.dot_dimension_numbers<[1], [0], [0], [1], [0, 0, 1, 1], [], []>} : vector<8x256xbf16>, vector<256x256xbf16>, vector<8x256xf32> -> vector<8x256xf32>
    %48 = vector.broadcast %12 : vector<1x256xf32> to vector<8x256xf32>
    %49 = arith.addf %48, %47 : vector<8x256xf32>
    %50 = vector.extract_strided_slice %49 {offsets = [0, 0], sizes = [8, 128], strides = [1, 1]} : vector<8x256xf32> to vector<8x128xf32>
    %51 = vector.extract_strided_slice %49 {offsets = [0, 128], sizes = [8, 128], strides = [1, 1]} : vector<8x256xf32> to vector<8x128xf32>
    %cst_24 = arith.constant 5.000000e-01 : f32
    %52 = vector.broadcast %cst_24 : f32 to vector<8x128xf32>
    %53 = arith.mulf %52, %50 : vector<8x128xf32>
    %54 = math.tanh %53 : vector<8x128xf32>
    %cst_25 = arith.constant 5.000000e-01 : f32
    %55 = vector.broadcast %cst_25 : f32 to vector<8x128xf32>
    %56 = arith.mulf %55, %54 : vector<8x128xf32>
    %cst_26 = arith.constant 5.000000e-01 : f32
    %57 = vector.broadcast %cst_26 : f32 to vector<8x128xf32>
    %58 = arith.addf %56, %57 : vector<8x128xf32>
    %59 = arith.mulf %5, %51 : vector<8x128xf32>
    %60 = math.tanh %59 : vector<8x128xf32>
    %61 = arith.mulf %5, %60 : vector<8x128xf32>
    %62 = arith.addf %61, %8 : vector<8x128xf32>
    %63 = arith.mulf %58, %62 : vector<8x128xf32>
    %64 = arith.mulf %58, %19 : vector<8x128xf32>
    %c64_i32_27 = arith.constant 64 : i32
    %65 = tpu.dynamic_rotate %63 by %c64_i32_27 dim 1 : vector<8x128xf32>, i32 -> vector<8x128xf32>
    %66 = arith.addf %64, %65 : vector<8x128xf32>
    %67 = math.tanh %66 : vector<8x128xf32>
    %68 = arith.mulf %62, %67 : vector<8x128xf32>
    %c64_i32_28 = arith.constant 64 : i32
    %69 = tpu.dynamic_rotate %68 by %c64_i32_28 dim 1 : vector<8x128xf32>, i32 -> vector<8x128xf32>
    %70 = arith.select %2, %69, %66 : vector<8x128xi1>, vector<8x128xf32>
    %71 = vector.extract_strided_slice %17 {offsets = [8, 0], sizes = [8, 256], strides = [1, 1]} : vector<64x256xf32> to vector<8x256xf32>
    %72 = arith.truncf %44 : vector<8x128xf32> to vector<8x128xbf16>
    %cst_29 = arith.constant dense<0.000000e+00> : vector<8x256xf32>
    %73 = tpu.matmul %72, %9, %cst_29 {dimension_numbers = #tpu.dot_dimension_numbers<[1], [0], [0], [1], [0, 0, 1, 1], [], []>} : vector<8x128xbf16>, vector<128x256xbf16>, vector<8x256xf32> -> vector<8x256xf32>
    %74 = arith.addf %71, %73 : vector<8x256xf32>
    %75 = vector.extract_strided_slice %74 {offsets = [0, 0], sizes = [8, 128], strides = [1, 1]} : vector<8x256xf32> to vector<8x128xf32>
    %76 = vector.extract_strided_slice %74 {offsets = [0, 128], sizes = [8, 128], strides = [1, 1]} : vector<8x256xf32> to vector<8x128xf32>
    %cst_30 = arith.constant 5.000000e-01 : f32
    %77 = vector.broadcast %cst_30 : f32 to vector<8x128xf32>
    %78 = arith.mulf %77, %75 : vector<8x128xf32>
    %79 = math.tanh %78 : vector<8x128xf32>
    %cst_31 = arith.constant 5.000000e-01 : f32
    %80 = vector.broadcast %cst_31 : f32 to vector<8x128xf32>
    %81 = arith.mulf %80, %79 : vector<8x128xf32>
    %cst_32 = arith.constant 5.000000e-01 : f32
    %82 = vector.broadcast %cst_32 : f32 to vector<8x128xf32>
    %83 = arith.addf %81, %82 : vector<8x128xf32>
    %84 = arith.mulf %5, %76 : vector<8x128xf32>
    %85 = math.tanh %84 : vector<8x128xf32>
    %86 = arith.mulf %5, %85 : vector<8x128xf32>
    %87 = arith.addf %86, %8 : vector<8x128xf32>
    %88 = arith.mulf %83, %87 : vector<8x128xf32>
    %89 = arith.mulf %83, %44 : vector<8x128xf32>
    %c64_i32_33 = arith.constant 64 : i32
    %90 = tpu.dynamic_rotate %88 by %c64_i32_33 dim 1 : vector<8x128xf32>, i32 -> vector<8x128xf32>
    %91 = arith.addf %89, %90 : vector<8x128xf32>
    %92 = math.tanh %91 : vector<8x128xf32>
    %93 = arith.mulf %87, %92 : vector<8x128xf32>
    %c64_i32_34 = arith.constant 64 : i32
    %94 = tpu.dynamic_rotate %93 by %c64_i32_34 dim 1 : vector<8x128xf32>, i32 -> vector<8x128xf32>
    %95 = arith.select %2, %94, %91 : vector<8x128xi1>, vector<8x128xf32>
    %96 = tpu.concatenate %95, %70 in 1 : vector<8x128xf32>, vector<8x128xf32> -> vector<8x256xf32>
    %97 = arith.truncf %96 : vector<8x256xf32> to vector<8x256xbf16>
    %cst_35 = arith.constant dense<0.000000e+00> : vector<8x256xf32>
    %98 = tpu.matmul %97, %10, %cst_35 {dimension_numbers = #tpu.dot_dimension_numbers<[1], [0], [0], [1], [0, 0, 1, 1], [], []>} : vector<8x256xbf16>, vector<256x256xbf16>, vector<8x256xf32> -> vector<8x256xf32>
    %99 = vector.broadcast %12 : vector<1x256xf32> to vector<8x256xf32>
    %100 = arith.addf %99, %98 : vector<8x256xf32>
    %101 = vector.extract_strided_slice %100 {offsets = [0, 0], sizes = [8, 128], strides = [1, 1]} : vector<8x256xf32> to vector<8x128xf32>
    %102 = vector.extract_strided_slice %100 {offsets = [0, 128], sizes = [8, 128], strides = [1, 1]} : vector<8x256xf32> to vector<8x128xf32>
    %cst_36 = arith.constant 5.000000e-01 : f32
    %103 = vector.broadcast %cst_36 : f32 to vector<8x128xf32>
    %104 = arith.mulf %103, %101 : vector<8x128xf32>
    %105 = math.tanh %104 : vector<8x128xf32>
    %cst_37 = arith.constant 5.000000e-01 : f32
    %106 = vector.broadcast %cst_37 : f32 to vector<8x128xf32>
    %107 = arith.mulf %106, %105 : vector<8x128xf32>
    %cst_38 = arith.constant 5.000000e-01 : f32
    %108 = vector.broadcast %cst_38 : f32 to vector<8x128xf32>
    %109 = arith.addf %107, %108 : vector<8x128xf32>
    %110 = arith.mulf %5, %102 : vector<8x128xf32>
    %111 = math.tanh %110 : vector<8x128xf32>
    %112 = arith.mulf %5, %111 : vector<8x128xf32>
    %113 = arith.addf %112, %8 : vector<8x128xf32>
    %114 = arith.mulf %109, %113 : vector<8x128xf32>
    %115 = arith.mulf %109, %70 : vector<8x128xf32>
    %c64_i32_39 = arith.constant 64 : i32
    %116 = tpu.dynamic_rotate %114 by %c64_i32_39 dim 1 : vector<8x128xf32>, i32 -> vector<8x128xf32>
    %117 = arith.addf %115, %116 : vector<8x128xf32>
    %118 = math.tanh %117 : vector<8x128xf32>
    %119 = arith.mulf %113, %118 : vector<8x128xf32>
    %c64_i32_40 = arith.constant 64 : i32
    %120 = tpu.dynamic_rotate %119 by %c64_i32_40 dim 1 : vector<8x128xf32>, i32 -> vector<8x128xf32>
    %121 = arith.select %2, %120, %117 : vector<8x128xi1>, vector<8x128xf32>
    %122 = vector.extract_strided_slice %17 {offsets = [16, 0], sizes = [8, 256], strides = [1, 1]} : vector<64x256xf32> to vector<8x256xf32>
    %123 = arith.truncf %95 : vector<8x128xf32> to vector<8x128xbf16>
    %cst_41 = arith.constant dense<0.000000e+00> : vector<8x256xf32>
    %124 = tpu.matmul %123, %9, %cst_41 {dimension_numbers = #tpu.dot_dimension_numbers<[1], [0], [0], [1], [0, 0, 1, 1], [], []>} : vector<8x128xbf16>, vector<128x256xbf16>, vector<8x256xf32> -> vector<8x256xf32>
    %125 = arith.addf %122, %124 : vector<8x256xf32>
    %126 = vector.extract_strided_slice %125 {offsets = [0, 0], sizes = [8, 128], strides = [1, 1]} : vector<8x256xf32> to vector<8x128xf32>
    %127 = vector.extract_strided_slice %125 {offsets = [0, 128], sizes = [8, 128], strides = [1, 1]} : vector<8x256xf32> to vector<8x128xf32>
    %cst_42 = arith.constant 5.000000e-01 : f32
    %128 = vector.broadcast %cst_42 : f32 to vector<8x128xf32>
    %129 = arith.mulf %128, %126 : vector<8x128xf32>
    %130 = math.tanh %129 : vector<8x128xf32>
    %cst_43 = arith.constant 5.000000e-01 : f32
    %131 = vector.broadcast %cst_43 : f32 to vector<8x128xf32>
    %132 = arith.mulf %131, %130 : vector<8x128xf32>
    %cst_44 = arith.constant 5.000000e-01 : f32
    %133 = vector.broadcast %cst_44 : f32 to vector<8x128xf32>
    %134 = arith.addf %132, %133 : vector<8x128xf32>
    %135 = arith.mulf %5, %127 : vector<8x128xf32>
    %136 = math.tanh %135 : vector<8x128xf32>
    %137 = arith.mulf %5, %136 : vector<8x128xf32>
    %138 = arith.addf %137, %8 : vector<8x128xf32>
    %139 = arith.mulf %134, %138 : vector<8x128xf32>
    %140 = arith.mulf %134, %95 : vector<8x128xf32>
    %c64_i32_45 = arith.constant 64 : i32
    %141 = tpu.dynamic_rotate %139 by %c64_i32_45 dim 1 : vector<8x128xf32>, i32 -> vector<8x128xf32>
    %142 = arith.addf %140, %141 : vector<8x128xf32>
    %143 = math.tanh %142 : vector<8x128xf32>
    %144 = arith.mulf %138, %143 : vector<8x128xf32>
    %c64_i32_46 = arith.constant 64 : i32
    %145 = tpu.dynamic_rotate %144 by %c64_i32_46 dim 1 : vector<8x128xf32>, i32 -> vector<8x128xf32>
    %146 = arith.select %2, %145, %142 : vector<8x128xi1>, vector<8x128xf32>
    %147 = tpu.concatenate %146, %121 in 1 : vector<8x128xf32>, vector<8x128xf32> -> vector<8x256xf32>
    %148 = arith.truncf %147 : vector<8x256xf32> to vector<8x256xbf16>
    %cst_47 = arith.constant dense<0.000000e+00> : vector<8x256xf32>
    %149 = tpu.matmul %148, %10, %cst_47 {dimension_numbers = #tpu.dot_dimension_numbers<[1], [0], [0], [1], [0, 0, 1, 1], [], []>} : vector<8x256xbf16>, vector<256x256xbf16>, vector<8x256xf32> -> vector<8x256xf32>
    %150 = vector.broadcast %12 : vector<1x256xf32> to vector<8x256xf32>
    %151 = arith.addf %150, %149 : vector<8x256xf32>
    %152 = vector.extract_strided_slice %151 {offsets = [0, 0], sizes = [8, 128], strides = [1, 1]} : vector<8x256xf32> to vector<8x128xf32>
    %153 = vector.extract_strided_slice %151 {offsets = [0, 128], sizes = [8, 128], strides = [1, 1]} : vector<8x256xf32> to vector<8x128xf32>
    %cst_48 = arith.constant 5.000000e-01 : f32
    %154 = vector.broadcast %cst_48 : f32 to vector<8x128xf32>
    %155 = arith.mulf %154, %152 : vector<8x128xf32>
    %156 = math.tanh %155 : vector<8x128xf32>
    %cst_49 = arith.constant 5.000000e-01 : f32
    %157 = vector.broadcast %cst_49 : f32 to vector<8x128xf32>
    %158 = arith.mulf %157, %156 : vector<8x128xf32>
    %cst_50 = arith.constant 5.000000e-01 : f32
    %159 = vector.broadcast %cst_50 : f32 to vector<8x128xf32>
    %160 = arith.addf %158, %159 : vector<8x128xf32>
    %161 = arith.mulf %5, %153 : vector<8x128xf32>
    %162 = math.tanh %161 : vector<8x128xf32>
    %163 = arith.mulf %5, %162 : vector<8x128xf32>
    %164 = arith.addf %163, %8 : vector<8x128xf32>
    %165 = arith.mulf %160, %164 : vector<8x128xf32>
    %166 = arith.mulf %160, %121 : vector<8x128xf32>
    %c64_i32_51 = arith.constant 64 : i32
    %167 = tpu.dynamic_rotate %165 by %c64_i32_51 dim 1 : vector<8x128xf32>, i32 -> vector<8x128xf32>
    %168 = arith.addf %166, %167 : vector<8x128xf32>
    %169 = math.tanh %168 : vector<8x128xf32>
    %170 = arith.mulf %164, %169 : vector<8x128xf32>
    %c64_i32_52 = arith.constant 64 : i32
    %171 = tpu.dynamic_rotate %170 by %c64_i32_52 dim 1 : vector<8x128xf32>, i32 -> vector<8x128xf32>
    %172 = arith.select %2, %171, %168 : vector<8x128xi1>, vector<8x128xf32>
    %173 = vector.extract_strided_slice %17 {offsets = [24, 0], sizes = [8, 256], strides = [1, 1]} : vector<64x256xf32> to vector<8x256xf32>
    %174 = arith.truncf %146 : vector<8x128xf32> to vector<8x128xbf16>
    %cst_53 = arith.constant dense<0.000000e+00> : vector<8x256xf32>
    %175 = tpu.matmul %174, %9, %cst_53 {dimension_numbers = #tpu.dot_dimension_numbers<[1], [0], [0], [1], [0, 0, 1, 1], [], []>} : vector<8x128xbf16>, vector<128x256xbf16>, vector<8x256xf32> -> vector<8x256xf32>
    %176 = arith.addf %173, %175 : vector<8x256xf32>
    %177 = vector.extract_strided_slice %176 {offsets = [0, 0], sizes = [8, 128], strides = [1, 1]} : vector<8x256xf32> to vector<8x128xf32>
    %178 = vector.extract_strided_slice %176 {offsets = [0, 128], sizes = [8, 128], strides = [1, 1]} : vector<8x256xf32> to vector<8x128xf32>
    %cst_54 = arith.constant 5.000000e-01 : f32
    %179 = vector.broadcast %cst_54 : f32 to vector<8x128xf32>
    %180 = arith.mulf %179, %177 : vector<8x128xf32>
    %181 = math.tanh %180 : vector<8x128xf32>
    %cst_55 = arith.constant 5.000000e-01 : f32
    %182 = vector.broadcast %cst_55 : f32 to vector<8x128xf32>
    %183 = arith.mulf %182, %181 : vector<8x128xf32>
    %cst_56 = arith.constant 5.000000e-01 : f32
    %184 = vector.broadcast %cst_56 : f32 to vector<8x128xf32>
    %185 = arith.addf %183, %184 : vector<8x128xf32>
    %186 = arith.mulf %5, %178 : vector<8x128xf32>
    %187 = math.tanh %186 : vector<8x128xf32>
    %188 = arith.mulf %5, %187 : vector<8x128xf32>
    %189 = arith.addf %188, %8 : vector<8x128xf32>
    %190 = arith.mulf %185, %189 : vector<8x128xf32>
    %191 = arith.mulf %185, %146 : vector<8x128xf32>
    %c64_i32_57 = arith.constant 64 : i32
    %192 = tpu.dynamic_rotate %190 by %c64_i32_57 dim 1 : vector<8x128xf32>, i32 -> vector<8x128xf32>
    %193 = arith.addf %191, %192 : vector<8x128xf32>
    %194 = math.tanh %193 : vector<8x128xf32>
    %195 = arith.mulf %189, %194 : vector<8x128xf32>
    %c64_i32_58 = arith.constant 64 : i32
    %196 = tpu.dynamic_rotate %195 by %c64_i32_58 dim 1 : vector<8x128xf32>, i32 -> vector<8x128xf32>
    %197 = arith.select %2, %196, %193 : vector<8x128xi1>, vector<8x128xf32>
    %198 = tpu.concatenate %197, %172 in 1 : vector<8x128xf32>, vector<8x128xf32> -> vector<8x256xf32>
    %199 = arith.truncf %198 : vector<8x256xf32> to vector<8x256xbf16>
    %cst_59 = arith.constant dense<0.000000e+00> : vector<8x256xf32>
    %200 = tpu.matmul %199, %10, %cst_59 {dimension_numbers = #tpu.dot_dimension_numbers<[1], [0], [0], [1], [0, 0, 1, 1], [], []>} : vector<8x256xbf16>, vector<256x256xbf16>, vector<8x256xf32> -> vector<8x256xf32>
    %201 = vector.broadcast %12 : vector<1x256xf32> to vector<8x256xf32>
    %202 = arith.addf %201, %200 : vector<8x256xf32>
    %203 = vector.extract_strided_slice %202 {offsets = [0, 0], sizes = [8, 128], strides = [1, 1]} : vector<8x256xf32> to vector<8x128xf32>
    %204 = vector.extract_strided_slice %202 {offsets = [0, 128], sizes = [8, 128], strides = [1, 1]} : vector<8x256xf32> to vector<8x128xf32>
    %cst_60 = arith.constant 5.000000e-01 : f32
    %205 = vector.broadcast %cst_60 : f32 to vector<8x128xf32>
    %206 = arith.mulf %205, %203 : vector<8x128xf32>
    %207 = math.tanh %206 : vector<8x128xf32>
    %cst_61 = arith.constant 5.000000e-01 : f32
    %208 = vector.broadcast %cst_61 : f32 to vector<8x128xf32>
    %209 = arith.mulf %208, %207 : vector<8x128xf32>
    %cst_62 = arith.constant 5.000000e-01 : f32
    %210 = vector.broadcast %cst_62 : f32 to vector<8x128xf32>
    %211 = arith.addf %209, %210 : vector<8x128xf32>
    %212 = arith.mulf %5, %204 : vector<8x128xf32>
    %213 = math.tanh %212 : vector<8x128xf32>
    %214 = arith.mulf %5, %213 : vector<8x128xf32>
    %215 = arith.addf %214, %8 : vector<8x128xf32>
    %216 = arith.mulf %211, %215 : vector<8x128xf32>
    %217 = arith.mulf %211, %172 : vector<8x128xf32>
    %c64_i32_63 = arith.constant 64 : i32
    %218 = tpu.dynamic_rotate %216 by %c64_i32_63 dim 1 : vector<8x128xf32>, i32 -> vector<8x128xf32>
    %219 = arith.addf %217, %218 : vector<8x128xf32>
    %220 = math.tanh %219 : vector<8x128xf32>
    %221 = arith.mulf %215, %220 : vector<8x128xf32>
    %c64_i32_64 = arith.constant 64 : i32
    %222 = tpu.dynamic_rotate %221 by %c64_i32_64 dim 1 : vector<8x128xf32>, i32 -> vector<8x128xf32>
    %223 = arith.select %2, %222, %219 : vector<8x128xi1>, vector<8x128xf32>
    %224 = vector.extract_strided_slice %17 {offsets = [32, 0], sizes = [8, 256], strides = [1, 1]} : vector<64x256xf32> to vector<8x256xf32>
    %225 = arith.truncf %197 : vector<8x128xf32> to vector<8x128xbf16>
    %cst_65 = arith.constant dense<0.000000e+00> : vector<8x256xf32>
    %226 = tpu.matmul %225, %9, %cst_65 {dimension_numbers = #tpu.dot_dimension_numbers<[1], [0], [0], [1], [0, 0, 1, 1], [], []>} : vector<8x128xbf16>, vector<128x256xbf16>, vector<8x256xf32> -> vector<8x256xf32>
    %227 = arith.addf %224, %226 : vector<8x256xf32>
    %228 = vector.extract_strided_slice %227 {offsets = [0, 0], sizes = [8, 128], strides = [1, 1]} : vector<8x256xf32> to vector<8x128xf32>
    %229 = vector.extract_strided_slice %227 {offsets = [0, 128], sizes = [8, 128], strides = [1, 1]} : vector<8x256xf32> to vector<8x128xf32>
    %cst_66 = arith.constant 5.000000e-01 : f32
    %230 = vector.broadcast %cst_66 : f32 to vector<8x128xf32>
    %231 = arith.mulf %230, %228 : vector<8x128xf32>
    %232 = math.tanh %231 : vector<8x128xf32>
    %cst_67 = arith.constant 5.000000e-01 : f32
    %233 = vector.broadcast %cst_67 : f32 to vector<8x128xf32>
    %234 = arith.mulf %233, %232 : vector<8x128xf32>
    %cst_68 = arith.constant 5.000000e-01 : f32
    %235 = vector.broadcast %cst_68 : f32 to vector<8x128xf32>
    %236 = arith.addf %234, %235 : vector<8x128xf32>
    %237 = arith.mulf %5, %229 : vector<8x128xf32>
    %238 = math.tanh %237 : vector<8x128xf32>
    %239 = arith.mulf %5, %238 : vector<8x128xf32>
    %240 = arith.addf %239, %8 : vector<8x128xf32>
    %241 = arith.mulf %236, %240 : vector<8x128xf32>
    %242 = arith.mulf %236, %197 : vector<8x128xf32>
    %c64_i32_69 = arith.constant 64 : i32
    %243 = tpu.dynamic_rotate %241 by %c64_i32_69 dim 1 : vector<8x128xf32>, i32 -> vector<8x128xf32>
    %244 = arith.addf %242, %243 : vector<8x128xf32>
    %245 = math.tanh %244 : vector<8x128xf32>
    %246 = arith.mulf %240, %245 : vector<8x128xf32>
    %c64_i32_70 = arith.constant 64 : i32
    %247 = tpu.dynamic_rotate %246 by %c64_i32_70 dim 1 : vector<8x128xf32>, i32 -> vector<8x128xf32>
    %248 = arith.select %2, %247, %244 : vector<8x128xi1>, vector<8x128xf32>
    %249 = tpu.concatenate %248, %223 in 1 : vector<8x128xf32>, vector<8x128xf32> -> vector<8x256xf32>
    %250 = arith.truncf %249 : vector<8x256xf32> to vector<8x256xbf16>
    %cst_71 = arith.constant dense<0.000000e+00> : vector<8x256xf32>
    %251 = tpu.matmul %250, %10, %cst_71 {dimension_numbers = #tpu.dot_dimension_numbers<[1], [0], [0], [1], [0, 0, 1, 1], [], []>} : vector<8x256xbf16>, vector<256x256xbf16>, vector<8x256xf32> -> vector<8x256xf32>
    %252 = vector.broadcast %12 : vector<1x256xf32> to vector<8x256xf32>
    %253 = arith.addf %252, %251 : vector<8x256xf32>
    %254 = vector.extract_strided_slice %253 {offsets = [0, 0], sizes = [8, 128], strides = [1, 1]} : vector<8x256xf32> to vector<8x128xf32>
    %255 = vector.extract_strided_slice %253 {offsets = [0, 128], sizes = [8, 128], strides = [1, 1]} : vector<8x256xf32> to vector<8x128xf32>
    %cst_72 = arith.constant 5.000000e-01 : f32
    %256 = vector.broadcast %cst_72 : f32 to vector<8x128xf32>
    %257 = arith.mulf %256, %254 : vector<8x128xf32>
    %258 = math.tanh %257 : vector<8x128xf32>
    %cst_73 = arith.constant 5.000000e-01 : f32
    %259 = vector.broadcast %cst_73 : f32 to vector<8x128xf32>
    %260 = arith.mulf %259, %258 : vector<8x128xf32>
    %cst_74 = arith.constant 5.000000e-01 : f32
    %261 = vector.broadcast %cst_74 : f32 to vector<8x128xf32>
    %262 = arith.addf %260, %261 : vector<8x128xf32>
    %263 = arith.mulf %5, %255 : vector<8x128xf32>
    %264 = math.tanh %263 : vector<8x128xf32>
    %265 = arith.mulf %5, %264 : vector<8x128xf32>
    %266 = arith.addf %265, %8 : vector<8x128xf32>
    %267 = arith.mulf %262, %266 : vector<8x128xf32>
    %268 = arith.mulf %262, %223 : vector<8x128xf32>
    %c64_i32_75 = arith.constant 64 : i32
    %269 = tpu.dynamic_rotate %267 by %c64_i32_75 dim 1 : vector<8x128xf32>, i32 -> vector<8x128xf32>
    %270 = arith.addf %268, %269 : vector<8x128xf32>
    %271 = math.tanh %270 : vector<8x128xf32>
    %272 = arith.mulf %266, %271 : vector<8x128xf32>
    %c64_i32_76 = arith.constant 64 : i32
    %273 = tpu.dynamic_rotate %272 by %c64_i32_76 dim 1 : vector<8x128xf32>, i32 -> vector<8x128xf32>
    %274 = arith.select %2, %273, %270 : vector<8x128xi1>, vector<8x128xf32>
    %275 = vector.extract_strided_slice %17 {offsets = [40, 0], sizes = [8, 256], strides = [1, 1]} : vector<64x256xf32> to vector<8x256xf32>
    %276 = arith.truncf %248 : vector<8x128xf32> to vector<8x128xbf16>
    %cst_77 = arith.constant dense<0.000000e+00> : vector<8x256xf32>
    %277 = tpu.matmul %276, %9, %cst_77 {dimension_numbers = #tpu.dot_dimension_numbers<[1], [0], [0], [1], [0, 0, 1, 1], [], []>} : vector<8x128xbf16>, vector<128x256xbf16>, vector<8x256xf32> -> vector<8x256xf32>
    %278 = arith.addf %275, %277 : vector<8x256xf32>
    %279 = vector.extract_strided_slice %278 {offsets = [0, 0], sizes = [8, 128], strides = [1, 1]} : vector<8x256xf32> to vector<8x128xf32>
    %280 = vector.extract_strided_slice %278 {offsets = [0, 128], sizes = [8, 128], strides = [1, 1]} : vector<8x256xf32> to vector<8x128xf32>
    %cst_78 = arith.constant 5.000000e-01 : f32
    %281 = vector.broadcast %cst_78 : f32 to vector<8x128xf32>
    %282 = arith.mulf %281, %279 : vector<8x128xf32>
    %283 = math.tanh %282 : vector<8x128xf32>
    %cst_79 = arith.constant 5.000000e-01 : f32
    %284 = vector.broadcast %cst_79 : f32 to vector<8x128xf32>
    %285 = arith.mulf %284, %283 : vector<8x128xf32>
    %cst_80 = arith.constant 5.000000e-01 : f32
    %286 = vector.broadcast %cst_80 : f32 to vector<8x128xf32>
    %287 = arith.addf %285, %286 : vector<8x128xf32>
    %288 = arith.mulf %5, %280 : vector<8x128xf32>
    %289 = math.tanh %288 : vector<8x128xf32>
    %290 = arith.mulf %5, %289 : vector<8x128xf32>
    %291 = arith.addf %290, %8 : vector<8x128xf32>
    %292 = arith.mulf %287, %291 : vector<8x128xf32>
    %293 = arith.mulf %287, %248 : vector<8x128xf32>
    %c64_i32_81 = arith.constant 64 : i32
    %294 = tpu.dynamic_rotate %292 by %c64_i32_81 dim 1 : vector<8x128xf32>, i32 -> vector<8x128xf32>
    %295 = arith.addf %293, %294 : vector<8x128xf32>
    %296 = math.tanh %295 : vector<8x128xf32>
    %297 = arith.mulf %291, %296 : vector<8x128xf32>
    %c64_i32_82 = arith.constant 64 : i32
    %298 = tpu.dynamic_rotate %297 by %c64_i32_82 dim 1 : vector<8x128xf32>, i32 -> vector<8x128xf32>
    %299 = arith.select %2, %298, %295 : vector<8x128xi1>, vector<8x128xf32>
    %300 = tpu.concatenate %299, %274 in 1 : vector<8x128xf32>, vector<8x128xf32> -> vector<8x256xf32>
    %301 = arith.truncf %300 : vector<8x256xf32> to vector<8x256xbf16>
    %cst_83 = arith.constant dense<0.000000e+00> : vector<8x256xf32>
    %302 = tpu.matmul %301, %10, %cst_83 {dimension_numbers = #tpu.dot_dimension_numbers<[1], [0], [0], [1], [0, 0, 1, 1], [], []>} : vector<8x256xbf16>, vector<256x256xbf16>, vector<8x256xf32> -> vector<8x256xf32>
    %303 = vector.broadcast %12 : vector<1x256xf32> to vector<8x256xf32>
    %304 = arith.addf %303, %302 : vector<8x256xf32>
    %305 = vector.extract_strided_slice %304 {offsets = [0, 0], sizes = [8, 128], strides = [1, 1]} : vector<8x256xf32> to vector<8x128xf32>
    %306 = vector.extract_strided_slice %304 {offsets = [0, 128], sizes = [8, 128], strides = [1, 1]} : vector<8x256xf32> to vector<8x128xf32>
    %cst_84 = arith.constant 5.000000e-01 : f32
    %307 = vector.broadcast %cst_84 : f32 to vector<8x128xf32>
    %308 = arith.mulf %307, %305 : vector<8x128xf32>
    %309 = math.tanh %308 : vector<8x128xf32>
    %cst_85 = arith.constant 5.000000e-01 : f32
    %310 = vector.broadcast %cst_85 : f32 to vector<8x128xf32>
    %311 = arith.mulf %310, %309 : vector<8x128xf32>
    %cst_86 = arith.constant 5.000000e-01 : f32
    %312 = vector.broadcast %cst_86 : f32 to vector<8x128xf32>
    %313 = arith.addf %311, %312 : vector<8x128xf32>
    %314 = arith.mulf %5, %306 : vector<8x128xf32>
    %315 = math.tanh %314 : vector<8x128xf32>
    %316 = arith.mulf %5, %315 : vector<8x128xf32>
    %317 = arith.addf %316, %8 : vector<8x128xf32>
    %318 = arith.mulf %313, %317 : vector<8x128xf32>
    %319 = arith.mulf %313, %274 : vector<8x128xf32>
    %c64_i32_87 = arith.constant 64 : i32
    %320 = tpu.dynamic_rotate %318 by %c64_i32_87 dim 1 : vector<8x128xf32>, i32 -> vector<8x128xf32>
    %321 = arith.addf %319, %320 : vector<8x128xf32>
    %322 = math.tanh %321 : vector<8x128xf32>
    %323 = arith.mulf %317, %322 : vector<8x128xf32>
    %c64_i32_88 = arith.constant 64 : i32
    %324 = tpu.dynamic_rotate %323 by %c64_i32_88 dim 1 : vector<8x128xf32>, i32 -> vector<8x128xf32>
    %325 = arith.select %2, %324, %321 : vector<8x128xi1>, vector<8x128xf32>
    %326 = vector.extract_strided_slice %17 {offsets = [48, 0], sizes = [8, 256], strides = [1, 1]} : vector<64x256xf32> to vector<8x256xf32>
    %327 = arith.truncf %299 : vector<8x128xf32> to vector<8x128xbf16>
    %cst_89 = arith.constant dense<0.000000e+00> : vector<8x256xf32>
    %328 = tpu.matmul %327, %9, %cst_89 {dimension_numbers = #tpu.dot_dimension_numbers<[1], [0], [0], [1], [0, 0, 1, 1], [], []>} : vector<8x128xbf16>, vector<128x256xbf16>, vector<8x256xf32> -> vector<8x256xf32>
    %329 = arith.addf %326, %328 : vector<8x256xf32>
    %330 = vector.extract_strided_slice %329 {offsets = [0, 0], sizes = [8, 128], strides = [1, 1]} : vector<8x256xf32> to vector<8x128xf32>
    %331 = vector.extract_strided_slice %329 {offsets = [0, 128], sizes = [8, 128], strides = [1, 1]} : vector<8x256xf32> to vector<8x128xf32>
    %cst_90 = arith.constant 5.000000e-01 : f32
    %332 = vector.broadcast %cst_90 : f32 to vector<8x128xf32>
    %333 = arith.mulf %332, %330 : vector<8x128xf32>
    %334 = math.tanh %333 : vector<8x128xf32>
    %cst_91 = arith.constant 5.000000e-01 : f32
    %335 = vector.broadcast %cst_91 : f32 to vector<8x128xf32>
    %336 = arith.mulf %335, %334 : vector<8x128xf32>
    %cst_92 = arith.constant 5.000000e-01 : f32
    %337 = vector.broadcast %cst_92 : f32 to vector<8x128xf32>
    %338 = arith.addf %336, %337 : vector<8x128xf32>
    %339 = arith.mulf %5, %331 : vector<8x128xf32>
    %340 = math.tanh %339 : vector<8x128xf32>
    %341 = arith.mulf %5, %340 : vector<8x128xf32>
    %342 = arith.addf %341, %8 : vector<8x128xf32>
    %343 = arith.mulf %338, %342 : vector<8x128xf32>
    %344 = arith.mulf %338, %299 : vector<8x128xf32>
    %c64_i32_93 = arith.constant 64 : i32
    %345 = tpu.dynamic_rotate %343 by %c64_i32_93 dim 1 : vector<8x128xf32>, i32 -> vector<8x128xf32>
    %346 = arith.addf %344, %345 : vector<8x128xf32>
    %347 = math.tanh %346 : vector<8x128xf32>
    %348 = arith.mulf %342, %347 : vector<8x128xf32>
    %c64_i32_94 = arith.constant 64 : i32
    %349 = tpu.dynamic_rotate %348 by %c64_i32_94 dim 1 : vector<8x128xf32>, i32 -> vector<8x128xf32>
    %350 = arith.select %2, %349, %346 : vector<8x128xi1>, vector<8x128xf32>
    %351 = tpu.concatenate %350, %325 in 1 : vector<8x128xf32>, vector<8x128xf32> -> vector<8x256xf32>
    %352 = arith.truncf %351 : vector<8x256xf32> to vector<8x256xbf16>
    %cst_95 = arith.constant dense<0.000000e+00> : vector<8x256xf32>
    %353 = tpu.matmul %352, %10, %cst_95 {dimension_numbers = #tpu.dot_dimension_numbers<[1], [0], [0], [1], [0, 0, 1, 1], [], []>} : vector<8x256xbf16>, vector<256x256xbf16>, vector<8x256xf32> -> vector<8x256xf32>
    %354 = vector.broadcast %12 : vector<1x256xf32> to vector<8x256xf32>
    %355 = arith.addf %354, %353 : vector<8x256xf32>
    %356 = vector.extract_strided_slice %355 {offsets = [0, 0], sizes = [8, 128], strides = [1, 1]} : vector<8x256xf32> to vector<8x128xf32>
    %357 = vector.extract_strided_slice %355 {offsets = [0, 128], sizes = [8, 128], strides = [1, 1]} : vector<8x256xf32> to vector<8x128xf32>
    %cst_96 = arith.constant 5.000000e-01 : f32
    %358 = vector.broadcast %cst_96 : f32 to vector<8x128xf32>
    %359 = arith.mulf %358, %356 : vector<8x128xf32>
    %360 = math.tanh %359 : vector<8x128xf32>
    %cst_97 = arith.constant 5.000000e-01 : f32
    %361 = vector.broadcast %cst_97 : f32 to vector<8x128xf32>
    %362 = arith.mulf %361, %360 : vector<8x128xf32>
    %cst_98 = arith.constant 5.000000e-01 : f32
    %363 = vector.broadcast %cst_98 : f32 to vector<8x128xf32>
    %364 = arith.addf %362, %363 : vector<8x128xf32>
    %365 = arith.mulf %5, %357 : vector<8x128xf32>
    %366 = math.tanh %365 : vector<8x128xf32>
    %367 = arith.mulf %5, %366 : vector<8x128xf32>
    %368 = arith.addf %367, %8 : vector<8x128xf32>
    %369 = arith.mulf %364, %368 : vector<8x128xf32>
    %370 = arith.mulf %364, %325 : vector<8x128xf32>
    %c64_i32_99 = arith.constant 64 : i32
    %371 = tpu.dynamic_rotate %369 by %c64_i32_99 dim 1 : vector<8x128xf32>, i32 -> vector<8x128xf32>
    %372 = arith.addf %370, %371 : vector<8x128xf32>
    %373 = math.tanh %372 : vector<8x128xf32>
    %374 = arith.mulf %368, %373 : vector<8x128xf32>
    %c64_i32_100 = arith.constant 64 : i32
    %375 = tpu.dynamic_rotate %374 by %c64_i32_100 dim 1 : vector<8x128xf32>, i32 -> vector<8x128xf32>
    %376 = arith.select %2, %375, %372 : vector<8x128xi1>, vector<8x128xf32>
    %377 = vector.extract_strided_slice %17 {offsets = [56, 0], sizes = [8, 256], strides = [1, 1]} : vector<64x256xf32> to vector<8x256xf32>
    %378 = arith.truncf %350 : vector<8x128xf32> to vector<8x128xbf16>
    %cst_101 = arith.constant dense<0.000000e+00> : vector<8x256xf32>
    %379 = tpu.matmul %378, %9, %cst_101 {dimension_numbers = #tpu.dot_dimension_numbers<[1], [0], [0], [1], [0, 0, 1, 1], [], []>} : vector<8x128xbf16>, vector<128x256xbf16>, vector<8x256xf32> -> vector<8x256xf32>
    %380 = arith.addf %377, %379 : vector<8x256xf32>
    %381 = vector.extract_strided_slice %380 {offsets = [0, 0], sizes = [8, 128], strides = [1, 1]} : vector<8x256xf32> to vector<8x128xf32>
    %382 = vector.extract_strided_slice %380 {offsets = [0, 128], sizes = [8, 128], strides = [1, 1]} : vector<8x256xf32> to vector<8x128xf32>
    %cst_102 = arith.constant 5.000000e-01 : f32
    %383 = vector.broadcast %cst_102 : f32 to vector<8x128xf32>
    %384 = arith.mulf %383, %381 : vector<8x128xf32>
    %385 = math.tanh %384 : vector<8x128xf32>
    %cst_103 = arith.constant 5.000000e-01 : f32
    %386 = vector.broadcast %cst_103 : f32 to vector<8x128xf32>
    %387 = arith.mulf %386, %385 : vector<8x128xf32>
    %cst_104 = arith.constant 5.000000e-01 : f32
    %388 = vector.broadcast %cst_104 : f32 to vector<8x128xf32>
    %389 = arith.addf %387, %388 : vector<8x128xf32>
    %390 = arith.mulf %5, %382 : vector<8x128xf32>
    %391 = math.tanh %390 : vector<8x128xf32>
    %392 = arith.mulf %5, %391 : vector<8x128xf32>
    %393 = arith.addf %392, %8 : vector<8x128xf32>
    %394 = arith.mulf %389, %393 : vector<8x128xf32>
    %395 = arith.mulf %389, %350 : vector<8x128xf32>
    %c64_i32_105 = arith.constant 64 : i32
    %396 = tpu.dynamic_rotate %394 by %c64_i32_105 dim 1 : vector<8x128xf32>, i32 -> vector<8x128xf32>
    %397 = arith.addf %395, %396 : vector<8x128xf32>
    %398 = math.tanh %397 : vector<8x128xf32>
    %399 = arith.mulf %393, %398 : vector<8x128xf32>
    %c64_i32_106 = arith.constant 64 : i32
    %400 = tpu.dynamic_rotate %399 by %c64_i32_106 dim 1 : vector<8x128xf32>, i32 -> vector<8x128xf32>
    %401 = arith.select %2, %400, %397 : vector<8x128xi1>, vector<8x128xf32>
    %402 = tpu.concatenate %401, %376 in 1 : vector<8x128xf32>, vector<8x128xf32> -> vector<8x256xf32>
    %403 = arith.truncf %402 : vector<8x256xf32> to vector<8x256xbf16>
    %cst_107 = arith.constant dense<0.000000e+00> : vector<8x256xf32>
    %404 = tpu.matmul %403, %10, %cst_107 {dimension_numbers = #tpu.dot_dimension_numbers<[1], [0], [0], [1], [0, 0, 1, 1], [], []>} : vector<8x256xbf16>, vector<256x256xbf16>, vector<8x256xf32> -> vector<8x256xf32>
    %405 = vector.broadcast %12 : vector<1x256xf32> to vector<8x256xf32>
    %406 = arith.addf %405, %404 : vector<8x256xf32>
    %407 = vector.extract_strided_slice %406 {offsets = [0, 0], sizes = [8, 128], strides = [1, 1]} : vector<8x256xf32> to vector<8x128xf32>
    %408 = vector.extract_strided_slice %406 {offsets = [0, 128], sizes = [8, 128], strides = [1, 1]} : vector<8x256xf32> to vector<8x128xf32>
    %cst_108 = arith.constant 5.000000e-01 : f32
    %409 = vector.broadcast %cst_108 : f32 to vector<8x128xf32>
    %410 = arith.mulf %409, %407 : vector<8x128xf32>
    %411 = math.tanh %410 : vector<8x128xf32>
    %cst_109 = arith.constant 5.000000e-01 : f32
    %412 = vector.broadcast %cst_109 : f32 to vector<8x128xf32>
    %413 = arith.mulf %412, %411 : vector<8x128xf32>
    %cst_110 = arith.constant 5.000000e-01 : f32
    %414 = vector.broadcast %cst_110 : f32 to vector<8x128xf32>
    %415 = arith.addf %413, %414 : vector<8x128xf32>
    %416 = arith.mulf %5, %408 : vector<8x128xf32>
    %417 = math.tanh %416 : vector<8x128xf32>
    %418 = arith.mulf %5, %417 : vector<8x128xf32>
    %419 = arith.addf %418, %8 : vector<8x128xf32>
    %420 = arith.mulf %415, %419 : vector<8x128xf32>
    %421 = arith.mulf %415, %376 : vector<8x128xf32>
    %c64_i32_111 = arith.constant 64 : i32
    %422 = tpu.dynamic_rotate %420 by %c64_i32_111 dim 1 : vector<8x128xf32>, i32 -> vector<8x128xf32>
    %423 = arith.addf %421, %422 : vector<8x128xf32>
    %424 = math.tanh %423 : vector<8x128xf32>
    %425 = arith.mulf %419, %424 : vector<8x128xf32>
    %c64_i32_112 = arith.constant 64 : i32
    %426 = tpu.dynamic_rotate %425 by %c64_i32_112 dim 1 : vector<8x128xf32>, i32 -> vector<8x128xf32>
    %427 = arith.select %2, %426, %423 : vector<8x128xi1>, vector<8x128xf32>
    %c0_113 = arith.constant 0 : index
    %c0_114 = arith.constant 0 : index
    %428 = vector.load %arg6[%c0_113, %c0_114] : memref<128x128xf32, #tpu.memory_space<vmem>>, vector<128x128xf32>
    %cst_115 = arith.constant dense<0.000000e+00> : vector<8x128xf32>
    %429 = tpu.matmul %427, %428, %cst_115 {dimension_numbers = #tpu.dot_dimension_numbers<[1], [0], [0], [1], [0, 0, 1, 1], [], []>} : vector<8x128xf32>, vector<128x128xf32>, vector<8x128xf32> -> vector<8x128xf32>
    %c0_116 = arith.constant 0 : index
    %c0_117 = arith.constant 0 : index
    %430 = vector.load %arg7[%c0_116, %c0_117] : memref<1x128xf32, #tpu.memory_space<vmem>>, vector<1x128xf32>
    %431 = vector.broadcast %430 : vector<1x128xf32> to vector<8x128xf32>
    %432 = arith.addf %429, %431 : vector<8x128xf32>
    %c0_118 = arith.constant 0 : index
    %c0_119 = arith.constant 0 : index
    %433 = vector.load %arg8[%c0_118, %c0_119] : memref<8x128xf32, #tpu.memory_space<vmem>>, vector<8x128xf32>
    tpu.vector_store %arg8[%c0_118, %c0_119], %432 {strides = array<i32>} : memref<8x128xf32, #tpu.memory_space<vmem>>, vector<8x128xf32>,
    return
  }
}

</mosaic_0001>

<bundles_post_ra>
// kernel: _forward_impl.1
= control target key start
LH: loop header
LB: loop body
LE: loop exit
PB: predicated region body
PF: predicated region fallthrough
CT: control target
= control target key end

     0   :  { %13 = vsyncpa [#allocation3], 0  ;;  %s3042_s0 = inlined_call_operand.vmem [shape: f32[64,8], index: 0, kind: input, shape index: {}]   ;;  %s3043_s1 = inlined_call_operand.vmem [shape: f32[8,256], index: 1, kind: input, shape index: {}]   ;;  %s3044_s2 = inlined_call_operand.vmem [shape: f32[1,256], index: 2, kind: input, shape index: {}]   ;;  %s3045_s3 = inlined_call_operand.hbm [shape: bf16[128,256], index: 3, kind: input, shape index: {}]   ;;  %s3046_s4 = inlined_call_operand.hbm [shape: bf16[256,256], index: 4, kind: input, shape index: {}]   ;;  %s3047_s5 = inlined_call_operand.vmem [shape: f32[1,256], index: 5, kind: input, shape index: {}]   ;;  %s3048_s6 = inlined_call_operand.hbm [shape: f32[128,128], index: 6, kind: input, shape index: {}]   ;;  %s3049_s7 = inlined_call_operand.vmem [shape: f32[1,128], index: 7, kind: input, shape index: {}]   ;;  %s3050_s8 = inlined_call_operand.vmem [shape: f32[8,128], index: 8, kind: output, shape index: {}]  }
   0x1   :  { %14 = vsyncpa [#allocation5], 0  ;;  %s2028_s27 = smov [#allocation4]   ;;  %s2029_s29 = smov [#allocation2]  }
   0x2   :  { %s38_s28 = sshll.u32 %s2028_s27, 4  ;;  %s26_s30 = sshll.u32 %s2029_s29, 4  ;;  %s39_s28 = int_to_ptr.vmem [resolvable:$true] %s38_s28  ;;  %s27_s30 = int_to_ptr.vmem [resolvable:$true] %s26_s30 }
   0x3   :  { %s1972_s9 = scalar_lea.vmem %s39_s28, 4096  ;;  %p1977_p1 = scmp.lt.s32.totalorder %s39_s28, %s39_s28 }
   0x4   :  { %p1973_p0 = scmp.ne.s32.totalorder %s39_s28, %s1972_s9  ;;  %p1978_p2 = scmp.lt.s32.totalorder %s1972_s9, %s1972_s9 }
   0x6   :  { %p1979_p3 = por %p1978_p2, %p1977_p1 }
   0x8   :  { %p1980_p4 = pnand %p1979_p3, %p1973_p0 }
   0xa   :  { %1983 = shalt.err (!%p1980_p4)
}
   0xb   :  { %s2030_s10 = smov 128   ;;  %s2031_s11 = smov 8  }
   0xc   :  { %44 = dma.hbm_to_vmem [thread:$0]  %s3046_s4, 4096, %s39_s28, [#allocation5], %s2030_s10, %s2030_s10, %s2031_s11  }
   0xd   :  { %s1992_s14 = scalar_lea.vmem %s27_s30, 2048  ;;  %p1997_p6 = scmp.lt.s32.totalorder %s27_s30, %s27_s30 }
   0xe   :  { %p1993_p5 = scmp.ne.s32.totalorder %s27_s30, %s1992_s14  ;;  %p1998_p7 = scmp.lt.s32.totalorder %s1992_s14, %s1992_s14 }
  0x10   :  { %p1999_p8 = por %p1998_p7, %p1997_p6 }
  0x12   :  { %p2000_p9 = pnand %p1999_p8, %p1993_p5 }
  0x14   :  { %2003 = shalt.err (!%p2000_p9)
}
  0x15   :  { %32 = dma.hbm_to_vmem [thread:$0]  %s3045_s3, 2048, %s27_s30, [#allocation3], %s2030_s10, %s2030_s10, %s2031_s11  }
  0x16   :  { %s2032_s17 = smov [#allocation6]  }
  0x17   :  { %s52_s18 = sshll.u32 %s2032_s17, 4  ;;  %s53_s18 = int_to_ptr.vmem [resolvable:$true] %s52_s18 }
  0x18   :  { %s2012_s19 = scalar_lea.vmem %s53_s18, 2048  ;;  %p2017_p11 = scmp.lt.s32.totalorder %s53_s18, %s53_s18 }
  0x19   :  { %p2013_p10 = scmp.ne.s32.totalorder %s53_s18, %s2012_s19  ;;  %p2018_p12 = scmp.lt.s32.totalorder %s2012_s19, %s2012_s19 }
  0x1b   :  { %p2019_p13 = por %p2018_p12, %p2017_p11 }
  0x1d   :  { %p2020_p0 = pnand %p2019_p13, %p2013_p10 }
  0x1f   :  { %2023 = shalt.err (!%p2020_p0)
}
  0x20   :  { %58 = dma.hbm_to_vmem [thread:$0]  %s3048_s6, 2048, %s53_s18, [#allocation5], %s2030_s10, %s2030_s10, %s2031_s11  }
  0x21   :  { %2024 = dma.done.wait [#allocation3], 2048  }
  0x22   :  { %2025 = vsyncadd [#allocation3], 4294965248 }
  0x23   :  { %2026 = dma.done.wait [#allocation5], 6144  }
  0x24   :  { %2027 = vsyncadd [#allocation5], 4294961152  ;;  %v3051_v0 = vmov 0.0   ;;  %v3055_v1 = vmov 0   ;;  %v2095_v2 = vld [vmem:[#allocation2 + $0x74] ss:$8 sps:$4 sm:$0xff]   ;;  %v71_v21 = vlaneseq }
  0x25   :  { %236 = vmatprep.mubr.f32.mxu1 %v3051_v0  ;;  %397 = vmatprep.mubr.bf16.mxu0 %v3055_v1  ;;  %3101 = vst [vmem:[#allocation9_spill] sm:$0xff] %v2095_v2  ;;  %v2097_v3 = vld [vmem:[#allocation2 + $0x70] ss:$8 sps:$4 sm:$0xff]   ;;  %v2100_v4 = vld [vmem:[#allocation2 + $0x64] ss:$8 sps:$4 sm:$0xff]   ;;  %vm147_vm0 = vcmask 64512  }
  0x26   :  { %365 = vmatprep.subr.bf16.mxu0 %v2095_v2  ;;  %v2103_v5 = vld [vmem:[#allocation2 + $0x60] ss:$8 sps:$4 sm:$0xff]   ;;  %v2106_v6 = vld [vmem:[#allocation2 + $0x54] ss:$8 sps:$4 sm:$0xff]   ;;  %v2109_v7 = vld [vmem:[#allocation2 + $0x50] ss:$8 sps:$4 sm:$0xff]  }
  0x27   :  { %366 = vmatpush1.bf16.msra.mxu0 %v2097_v3  ;;  %v2112_v8 = vld [vmem:[#allocation2 + $0x44] ss:$8 sps:$4 sm:$0xff]   ;;  %v2124_v12 = vld [vmem:[#allocation2 + $0x40] ss:$8 sps:$4 sm:$0xff]   ;;  %v2126_v13 = vld [vmem:[#allocation2 + $0x34] ss:$8 sps:$4 sm:$0xff]  }
  0x28   :  { %367 = vmatprep.subr.bf16.mxu0 %v2100_v4  ;;  %v135_v9 = vld [vmem:[%s3043_s1 + $0x8] sm:$0xff]  ;;  %v134_v10 = vld [vmem:[%s3043_s1] sm:$0xff]  ;;  %v2130_v14 = vld [vmem:[#allocation2 + $0x30] ss:$8 sps:$4 sm:$0xff]   ;;  %v2171_v22 = vshrl.u32 %v71_v21, 7  ;;  %v2182_v28 = vand.u32 127, %v71_v21 }
  0x29   :  { %202 = vmatprep.subr.mxu1 %v135_v9  ;;  %v126_v11 = vld [vmem:[%s3042_s0] sm:$0xff]  ;;  %v2142_v17 = vld [vmem:[#allocation2 + $0x14] ss:$8 sps:$4 sm:$0xff]   ;;  %v2150_v18 = vld [vmem:[#allocation2 + $0x10] ss:$8 sps:$4 sm:$0xff]   ;;  %v2035_v35 = vmov 0.5  }
  0x2a   :  { %203 = vmatpush1.msra.mxu1 %v134_v10  ;;  %v2134_v15 = vld [vmem:[#allocation2 + $0x24] ss:$8 sps:$4 sm:$0xff]   ;;  %v2140_v16 = vld [vmem:[#allocation2 + $0x20] ss:$8 sps:$4 sm:$0xff]   ;;  %v3054_v23 = vsub.s32 0, %v2171_v22  ;;  %v3053_v26 = vsub.s32 1, %v2171_v22 }
  0x2b   :  { %368 = vmatpush1.bf16.msra.mxu0 %v2103_v5  ;;  %1628 = vmatmul.mubr.msk.f32.vlgmr.msra.gmra.mxu1 %vm147_vm0, %v126_v11  ;;  %v2154_v19 = vld [vmem:[#allocation2 + $0x4] ss:$8 sps:$4 sm:$0xff]   ;;  %v2158_v20 = vld [vmem:[#allocation2] ss:$8 sps:$4 sm:$0xff]   ;;  %vm73_vm1 = vcmp.lt.s32.totalorder %v2182_v28, 64  ;;  %v128_v59 = vld [vmem:[%s3042_s0 + $0x10] sm:$0xff] }
  0x2c   :  { %369 = vmatprep.subr.bf16.mxu0 %v2106_v6  ;;  %660 = vmatprep.subr.bf16.mxu1 %v2095_v2  ;;  %v124_v24 = vld [vmem:[%s3044_s2] sm:$0x3]  ;;  %v2193_v36 = vsel %vm73_vm1, 1.0, %v2035_v35  ;;  %v2198_v46 = vsel %vm73_vm1, 0.0, %v2035_v35  ;;  %s2036_s2 = smov 64   ;;  %v127_v56 = vld [vmem:[%s3042_s0 + $0x8] sm:$0xff] }
  0x2d   :  { %242 = vmatprep.mubr.f32.mxu1 %v3051_v0  ;;  %661 = vmatpush1.bf16.msra.mxu1 %v2097_v3  ;;  %v2179_v25 = vrot.slane %v124_v24, %v3054_v23  ;;  %v2187_v30 = vrot.slane %v124_v24, %v3053_v26  ;;  %v2209_v51 = vld [vmem:[#allocation4 + $0x74] ss:$8 sps:$4 sm:$0xff]   ;;  %v2211_v52 = vld [vmem:[#allocation4 + $0x70] ss:$8 sps:$4 sm:$0xff]   ;;  %v2213_v53 = vld [vmem:[#allocation4 + $0x64] ss:$8 sps:$4 sm:$0xff]  }
  0x2e   :  { %662 = vmatprep.subr.bf16.mxu1 %v2100_v4  ;;  %v2218_v54 = vld [vmem:[#allocation4 + $0x60] ss:$8 sps:$4 sm:$0xff]   ;;  %v2221_v55 = vld [vmem:[#allocation4 + $0x54] ss:$8 sps:$4 sm:$0xff]   ;;  %v2227_v57 = vld [vmem:[#allocation4 + $0x50] ss:$8 sps:$4 sm:$0xff]  }
  0x2f   :  { %370 = vmatpush1.bf16.msra.mxu0 %v2109_v7  ;;  %3102 = vst [vmem:[#allocation10_spill] sm:$0xff] %v2179_v25  ;;  %1629 = vmatmul.mubr.msk.f32.gmra.mxu1 %vm147_vm0, %v127_v56  ;;  %v2231_v58 = vld [vmem:[#allocation4 + $0x44] ss:$8 sps:$4 sm:$0xff]   ;;  %v2238_v60 = vld [vmem:[#allocation4 + $0x40] ss:$8 sps:$4 sm:$0xff]   ;;  %v129_v62 = vld [vmem:[%s3042_s0 + $0x18] sm:$0xff] }
  0x30   :  { %371 = vmatprep.subr.bf16.mxu0 %v2112_v8  ;;  %248 = vmatprep.mubr.f32.mxu1 %v3051_v0  ;;  %v2242_v61 = vld [vmem:[#allocation4 + $0x34] ss:$8 sps:$4 sm:$0xff]   ;;  %v2249_v63 = vld [vmem:[#allocation4 + $0x30] ss:$8 sps:$4 sm:$0xff]   ;;  %v2253_v9 = vld [vmem:[#allocation4 + $0x24] ss:$8 sps:$4 sm:$0xff]  }
  0x31   :  { %663 = vmatpush1.bf16.msra.mxu1 %v2103_v5  ;;  %v130_v10 = vld [vmem:[%s3042_s0 + $0x20] sm:$0xff]  ;;  %v2264_v21 = vld [vmem:[#allocation4 + $0x14] ss:$8 sps:$4 sm:$0xff]   ;;  %v131_v24 = vld [vmem:[%s3042_s0 + $0x28] sm:$0xff]  ;;  %vm2038_vm2 = vmmov 0  }
  0x32   :  { %664 = vmatprep.subr.bf16.mxu1 %v2106_v6  ;;  %v2260_v11 = vld [vmem:[#allocation4 + $0x20] ss:$8 sps:$4 sm:$0xff]   ;;  %v2293_v35 = vld [vmem:[#allocation4 + $0xf0] ss:$8 sps:$4 sm:$0xff]  }
  0x33   :  { %372 = vmatpush1.bf16.msra.mxu0 %v2124_v12  ;;  %1630 = vmatmul.mubr.msk.f32.gmra.mxu1 %vm147_vm0, %v128_v59  ;;  %v2331_v56 = vld [vmem:[#allocation4 + $0x90] ss:$8 sps:$4 sm:$0xff]   ;;  %v2334_v59 = vld [vmem:[#allocation4 + $0x84] ss:$8 sps:$4 sm:$0xff]  }
  0x34   :  { %373 = vmatprep.subr.bf16.mxu0 %v2126_v13  ;;  %254 = vmatprep.mubr.f32.mxu1 %v3051_v0  ;;  %3110 = vst [vmem:[#allocation18_spill] sm:$0xff] %v2331_v56  ;;  %3111 = vst [vmem:[#allocation19_spill] sm:$0xff] %v2334_v59 }
  0x35   :  { %665 = vmatpush1.bf16.msra.mxu1 %v2109_v7 }
  0x36   :  { %666 = vmatprep.subr.bf16.mxu1 %v2112_v8 }
  0x37   :  { %374 = vmatpush1.bf16.msra.mxu0 %v2130_v14  ;;  %1631 = vmatmul.mubr.msk.f32.gmra.mxu1 %vm147_vm0, %v129_v62 }
  0x38   :  { %375 = vmatprep.subr.bf16.mxu0 %v2134_v15  ;;  %260 = vmatprep.mubr.f32.mxu1 %v3051_v0 }
  0x39   :  { %667 = vmatpush1.bf16.msra.mxu1 %v2124_v12 }
  0x3a   :  { %668 = vmatprep.subr.bf16.mxu1 %v2126_v13 }
  0x3b   :  { %376 = vmatpush1.bf16.msra.mxu0 %v2140_v16  ;;  %1632 = vmatmul.mubr.msk.f32.gmra.mxu1 %vm147_vm0, %v130_v10 }
  0x3c   :  { %377 = vmatprep.subr.bf16.mxu0 %v2142_v17  ;;  %266 = vmatprep.mubr.f32.mxu1 %v3051_v0 }
  0x3d   :  { %669 = vmatpush1.bf16.msra.mxu1 %v2130_v14 }
  0x3e   :  { %670 = vmatprep.subr.bf16.mxu1 %v2134_v15 }
  0x3f   :  { %378 = vmatpush1.bf16.msra.mxu0 %v2150_v18  ;;  %1633 = vmatmul.mubr.msk.f32.gmra.mxu1 %vm147_vm0, %v131_v24 }
  0x40   :  { %379 = vmatprep.subr.bf16.mxu0 %v2154_v19  ;;  %272 = vmatprep.mubr.f32.mxu1 %v3051_v0 }
  0x41   :  { %671 = vmatpush1.bf16.msra.mxu1 %v2140_v16 }
  0x42   :  { %672 = vmatprep.subr.bf16.mxu1 %v2142_v17 }
  0x43   :  { %380 = vmatpush1.bf16.msra.mxu0 %v2158_v20 }
  0x44   :  { %588 = vmatprep.subr.bf16.mxu0 %v2209_v51 }
  0x45   :  { %673 = vmatpush1.bf16.msra.mxu1 %v2150_v18 }
  0x46   :  { %398 = vmatmul.mubr.bf16.vlgmr.msra.gmra.mxu0 %v3055_v1  ;;  %674 = vmatprep.subr.bf16.mxu1 %v2154_v19 }
  0x47   :  { %589 = vmatpush1.bf16.msra.mxu0 %v2211_v52 }
  0x48   :  { %590 = vmatprep.subr.bf16.mxu0 %v2213_v53 }
  0x49   :  { %675 = vmatpush1.bf16.msra.mxu1 %v2158_v20 }
  0x4a   :  { %723 = vmatprep.subr.bf16.mxu1 %v2209_v51 }
  0x4b   :  { %591 = vmatpush1.bf16.msra.mxu0 %v2218_v54 }
  0x4c   :  { %592 = vmatprep.subr.bf16.mxu0 %v2221_v55 }
  0x4f   :  { %593 = vmatpush1.bf16.msra.mxu0 %v2227_v57 }
  0x50   :  { %594 = vmatprep.subr.bf16.mxu0 %v2231_v58 }
  0x53   :  { %595 = vmatpush1.bf16.msra.mxu0 %v2238_v60 }
  0x54   :  { %596 = vmatprep.subr.bf16.mxu0 %v2242_v61 }
  0x57   :  { %597 = vmatpush1.bf16.msra.mxu0 %v2249_v63 }
  0x58   :  { %598 = vmatprep.subr.bf16.mxu0 %v2253_v9 }
  0x5b   :  { %599 = vmatpush1.bf16.msra.mxu0 %v2260_v11 }
  0x5c   :  { %600 = vmatprep.subr.bf16.mxu0 %v2264_v21 }
  0xeb   :  { %v238_v27 = vpop.f32.mrf.mxu1 }
  0xec   :  { %v239_v29 = vadd.f32 %v238_v27, %v2179_v25  ;;  %v2271_v27 = vld [vmem:[#allocation4 + $0x10] ss:$8 sps:$4 sm:$0xff]  }
  0xed   :  { %v240_v31 = vpop.f32.mrf.mxu1  ;;  %601 = vmatpush1.bf16.msra.mxu0 %v2271_v27 }
  0xee   :  { %v241_v33 = vadd.f32 %v240_v31, %v2187_v30  ;;  %v132_v31 = vld [vmem:[%s3042_s0 + $0x30] sm:$0xff] }
  0xef   :  { %1634 = vmatmul.mubr.msk.f32.gmra.mxu1 %vm147_vm0, %v132_v31  ;;  %v2339_v31 = vld [vmem:[#allocation4 + $0x80] ss:$8 sps:$4 sm:$0xff]  }
  0xf0   :  { %278 = vmatprep.mubr.f32.mxu1 %v3051_v0  ;;  %3112 = vst [vmem:[#allocation20_spill] sm:$0xff] %v2339_v31 }
 0x106   :  { %v399_v32 = vpop.f32.mrf.mxu0 }
 0x107   :  { %v406_v34 = vadd.f32 %v399_v32, %v239_v29  ;;  %v2275_v29 = vld [vmem:[#allocation4 + $0x4] ss:$8 sps:$4 sm:$0xff]   ;;  %v2282_v32 = vld [vmem:[#allocation4] ss:$8 sps:$4 sm:$0xff]  }
 0x108   :  { %v401_v37 = vpop.f32.mrf.mxu0  ;;  %602 = vmatprep.subr.bf16.mxu0 %v2275_v29 }
 0x109   :  { %v408_v38 = vmul.f32 0.5, %v406_v34  ;;  %v407_v39 = vadd.f32 %v401_v37, %v241_v33  ;;  %v2286_v33 = vld [vmem:[#allocation4 + $0xf4] ss:$8 sps:$4 sm:$0xff]   ;;  %603 = vmatpush1.bf16.msra.mxu0 %v2282_v32  ;;  %v2297_v37 = vld [vmem:[#allocation4 + $0xe4] ss:$8 sps:$4 sm:$0xff]  }
 0x10a   :  { %v403_v40 = vpop.f32.mrf.mxu0  ;;  %v133_v34 = vld [vmem:[%s3042_s0 + $0x38] sm:$0xff]  ;;  %604 = vmatprep.subr.bf16.mxu0 %v2286_v33 }
 0x10b   :  { %1820 = vtanh.f32 %v408_v38  ;;  %v412_v41 = vmul.f32 %v407_v39, %v2193_v36  ;;  %1635 = vmatmul.mubr.msk.f32.gmra.mxu1 %vm147_vm0, %v133_v34  ;;  %v2301_v38 = vld [vmem:[#allocation4 + $0xe0] ss:$8 sps:$4 sm:$0xff]   ;;  %v2304_v39 = vld [vmem:[#allocation4 + $0xd4] ss:$8 sps:$4 sm:$0xff]   ;;  %v2307_v40 = vld [vmem:[#allocation4 + $0xd0] ss:$8 sps:$4 sm:$0xff]  }
 0x10c   :  { %v404_v42 = vpop.f32.mrf.mxu0  ;;  %692 = vmatprep.mubr.bf16.mxu1 %v3055_v1  ;;  %v2037_v34 = vmov 0.0|0.0  }
 0x10d   :  { %1822 = vtanh.f32 %v412_v41  ;;  %605 = vmatpush2.bf16.msra.mxu0 %v2293_v35  ;;  %v2310_v41 = vld [vmem:[#allocation4 + $0xc4] ss:$8 sps:$4 sm:$0xff]   ;;  %v2313_v42 = vld [vmem:[#allocation4 + $0xc0] ss:$8 sps:$4 sm:$0xff]   ;;  %620 = vmatprep.mubr.bf16.mxu0 %v2037_v34 }
 0x10e   :  { %606 = vmatprep.subr.bf16.mxu0 %v2297_v37  ;;  %3103 = vst [vmem:[#allocation11_spill] sm:$0xff] %v2310_v41  ;;  %3104 = vst [vmem:[#allocation12_spill] sm:$0xff] %v2313_v42 }
 0x111   :  { %607 = vmatpush2.bf16.msra.mxu0 %v2301_v38 }
 0x112   :  { %608 = vmatprep.subr.bf16.mxu0 %v2304_v39 }
 0x115   :  { %609 = vmatpush2.bf16.msra.mxu0 %v2307_v40 }
 0x116   :  { %610 = vmatprep.subr.bf16.mxu0 %v2310_v41 }
 0x118   :  { %v1821_v43 = vpop.eup %1820 }
 0x119   :  { %v410_v44 = vmul.f32 0.5, %v1821_v43  ;;  %v2316_v43 = vld [vmem:[#allocation4 + $0xb4] ss:$8 sps:$4 sm:$0xff]   ;;  %611 = vmatpush2.bf16.msra.mxu0 %v2313_v42 }
 0x11a   :  { %v1823_v45 = vpop.eup %1822  ;;  %3105 = vst [vmem:[#allocation13_spill] sm:$0xff] %v2316_v43  ;;  %612 = vmatprep.subr.bf16.mxu0 %v2316_v43 }
 0x11b   :  { %v414_v47 = vmul.f32 %v1823_v45, %v2193_v36  ;;  %v2201_v48 = vadd.f32 0.5, %v410_v44  ;;  %v2319_v44 = vld [vmem:[#allocation4 + $0xb0] ss:$8 sps:$4 sm:$0xff]   ;;  %v2322_v45 = vld [vmem:[#allocation4 + $0xa4] ss:$8 sps:$4 sm:$0xff]  }
 0x11c   :  { %3106 = vst [vmem:[#allocation14_spill] sm:$0xff] %v2319_v44  ;;  %3107 = vst [vmem:[#allocation15_spill] sm:$0xff] %v2322_v45 }
 0x11d   :  { %v2204_v49 = vadd.f32 %v414_v47, %v2198_v46  ;;  %613 = vmatpush2.bf16.msra.mxu0 %v2319_v44  ;;  %v2325_v47 = vld [vmem:[#allocation4 + $0xa0] ss:$8 sps:$4 sm:$0xff]   ;;  %v417_v62 = vmul.f32 0.0, %v2201_v48 }
 0x11e   :  { %3108 = vst [vmem:[#allocation16_spill] sm:$0xff] %v2325_v47  ;;  %614 = vmatprep.subr.bf16.mxu0 %v2322_v45 }
 0x11f   :  { %v416_v50 = vmul.f32 %v2204_v49, %v2201_v48 }
 0x121   :  { %418 = vrot.lane.b32.xlu0 %v416_v50, %s2036_s2  ;;  %v2328_v50 = vld [vmem:[#allocation4 + $0x94] ss:$8 sps:$4 sm:$0xff]   ;;  %615 = vmatpush2.bf16.msra.mxu0 %v2325_v47 }
 0x122   :  { %3109 = vst [vmem:[#allocation17_spill] sm:$0xff] %v2328_v50  ;;  %616 = vmatprep.subr.bf16.mxu0 %v2328_v50 }
 0x125   :  { %617 = vmatpush2.bf16.msra.mxu0 %v2331_v56 }
 0x126   :  { %618 = vmatprep.subr.bf16.mxu0 %v2334_v59 }
 0x129   :  { %619 = vmatpush2.bf16.msra.mxu0 %v2339_v31 }
 0x12a   :  { %784 = vmatprep.subr.bf16.mxu0 %v2095_v2 }
 0x193   :  { %v419_v10 = vpop.permute.xlu0 %418 }
 0x194   :  { %v420_v24 = vadd.f32 %v419_v10, %v417_v62 }
 0x196   :  { %1824 = vtanh.f32 %v420_v24 }
 0x1a3   :  { %v1825_v0 = vpop.eup %1824 }
 0x1a4   :  { %v422_v26 = vmul.f32 %v1825_v0, %v2204_v49  ;;  %v244_v0 = vpop.f32.mrf.mxu1 }
 0x1a6   :  { %423 = vrot.lane.b32.xlu0 %v422_v26, %s2036_s2 }
 0x218   :  { %v424_v23 = vpop.permute.xlu0 %423 }
 0x219   :  { %v2347_v48 = vsel %vm73_vm1, %v424_v23, %v420_v24  ;;  %v246_v23 = vpop.f32.mrf.mxu1 }
 0x21a   :  { %v426_v62 = vpack.c.bf16 %v2347_v48, %v2347_v48 }
 0x21b   :  { %v2400_v26 = vpop.f32.mrf.mxu1 }
 0x21c   :  { %621 = vmatmul.mubr.bf16.vlgmr.msra.gmra.mxu0 %v426_v62  ;;  %693 = vmatmul.mubr.bf16.vlgmr.msra.gmra.mxu1 %v426_v62  ;;  %3113 = vst [vmem:[#allocation21_spill] sm:$0xff] %v2400_v26 }
 0x21d   :  { %724 = vmatpush1.bf16.msra.mxu1 %v2211_v52  ;;  %785 = vmatpush1.bf16.msra.mxu0 %v2097_v3  ;;  %v2402_v49 = vpop.f32.mrf.mxu1 }
 0x21e   :  { %725 = vmatprep.subr.bf16.mxu1 %v2213_v53  ;;  %786 = vmatprep.subr.bf16.mxu0 %v2100_v4  ;;  %3114 = vst [vmem:[#allocation22_spill] sm:$0xff] %v2402_v49 }
 0x21f   :  { %816 = vmatprep.mubr.bf16.mxu0 %v3055_v1  ;;  %v2404_v10 = vpop.f32.mrf.mxu1 }
 0x220   :  { %3115 = vst [vmem:[#allocation23_spill] sm:$0xff] %v2404_v10  ;;  %v125_v10 = vld [vmem:[%s3047_s5] sm:$0x3] }
 0x221   :  { %726 = vmatpush1.bf16.msra.mxu1 %v2218_v54  ;;  %787 = vmatpush1.bf16.msra.mxu0 %v2103_v5  ;;  %v2406_v24 = vpop.f32.mrf.mxu1 }
 0x222   :  { %727 = vmatprep.subr.bf16.mxu1 %v2221_v55  ;;  %788 = vmatprep.subr.bf16.mxu0 %v2106_v6  ;;  %3116 = vst [vmem:[#allocation24_spill] sm:$0xff] %v2406_v24 }
 0x223   :  { %v2408_v34 = vpop.f32.mrf.mxu1 }
 0x224   :  { %3117 = vst [vmem:[#allocation25_spill] sm:$0xff] %v2408_v34  ;;  %v3125_v34 = vsub.s32 0, %v2171_v22 }
 0x225   :  { %728 = vmatpush1.bf16.msra.mxu1 %v2227_v57  ;;  %789 = vmatpush1.bf16.msra.mxu0 %v2109_v7  ;;  %v2410_v62 = vpop.f32.mrf.mxu1 }
 0x226   :  { %729 = vmatprep.subr.bf16.mxu1 %v2231_v58  ;;  %790 = vmatprep.subr.bf16.mxu0 %v2112_v8  ;;  %3118 = vst [vmem:[#allocation26_spill] sm:$0xff] %v2410_v62  ;;  %v2429_v24 = vrot.slane %v125_v10, %v3125_v34 }
 0x227   :  { %v2412_v1 = vpop.f32.mrf.mxu1 }
 0x228   :  { %3119 = vst [vmem:[#allocation27_spill] sm:$0xff] %v2412_v1  ;;  %3126 = vst [vmem:[#allocation33_spill] sm:$0xff] %v2429_v24  ;;  %v245_v1 = vadd.f32 %v244_v0, %v2179_v25 }
 0x229   :  { %730 = vmatpush1.bf16.msra.mxu1 %v2238_v60  ;;  %791 = vmatpush1.bf16.msra.mxu0 %v2124_v12 }
 0x22a   :  { %731 = vmatprep.subr.bf16.mxu1 %v2242_v61  ;;  %792 = vmatprep.subr.bf16.mxu0 %v2126_v13 }
 0x22d   :  { %732 = vmatpush1.bf16.msra.mxu1 %v2249_v63  ;;  %793 = vmatpush1.bf16.msra.mxu0 %v2130_v14 }
 0x22e   :  { %733 = vmatprep.subr.bf16.mxu1 %v2253_v9  ;;  %794 = vmatprep.subr.bf16.mxu0 %v2134_v15 }
 0x231   :  { %734 = vmatpush1.bf16.msra.mxu1 %v2260_v11  ;;  %795 = vmatpush1.bf16.msra.mxu0 %v2140_v16 }
 0x232   :  { %735 = vmatprep.subr.bf16.mxu1 %v2264_v21  ;;  %796 = vmatprep.subr.bf16.mxu0 %v2142_v17 }
 0x235   :  { %736 = vmatpush1.bf16.msra.mxu1 %v2271_v27  ;;  %797 = vmatpush1.bf16.msra.mxu0 %v2150_v18 }
 0x236   :  { %737 = vmatprep.subr.bf16.mxu1 %v2275_v29  ;;  %798 = vmatprep.subr.bf16.mxu0 %v2154_v19 }
 0x239   :  { %738 = vmatpush1.bf16.msra.mxu1 %v2282_v32  ;;  %799 = vmatpush1.bf16.msra.mxu0 %v2158_v20 }
 0x23a   :  { %739 = vmatprep.subr.bf16.mxu1 %v2286_v33  ;;  %847 = vmatprep.subr.bf16.mxu0 %v2209_v51 }
 0x23d   :  { %740 = vmatpush2.bf16.msra.mxu1 %v2293_v35 }
 0x23e   :  { %741 = vmatprep.subr.bf16.mxu1 %v2297_v37 }
 0x241   :  { %742 = vmatpush2.bf16.msra.mxu1 %v2301_v38 }
 0x242   :  { %743 = vmatprep.subr.bf16.mxu1 %v2304_v39 }
 0x245   :  { %744 = vmatpush2.bf16.msra.mxu1 %v2307_v40 }
 0x246   :  { %745 = vmatprep.subr.bf16.mxu1 %v2310_v41 }
 0x249   :  { %746 = vmatpush2.bf16.msra.mxu1 %v2313_v42 }
 0x24a   :  { %747 = vmatprep.subr.bf16.mxu1 %v2316_v43 }
 0x24d   :  { %748 = vmatpush2.bf16.msra.mxu1 %v2319_v44 }
 0x24e   :  { %749 = vmatprep.subr.bf16.mxu1 %v2322_v45 }
 0x251   :  { %750 = vmatpush2.bf16.msra.mxu1 %v2325_v47 }
 0x252   :  { %751 = vmatprep.subr.bf16.mxu1 %v2328_v50 }
 0x255   :  { %752 = vmatpush2.bf16.msra.mxu1 %v2331_v56 }
 0x256   :  { %753 = vmatprep.subr.bf16.mxu1 %v2334_v59  ;;  %v2414_v59 = vpop.f32.mrf.mxu1 }
 0x257   :  { %3120 = vst [vmem:[#allocation28_spill] sm:$0xff] %v2414_v59  ;;  %v3127_v59 = vsub.s32 1, %v2171_v22 }
 0x259   :  { %754 = vmatpush2.bf16.msra.mxu1 %v2339_v31  ;;  %v2416_v31 = vpop.f32.mrf.mxu1  ;;  %v2434_v62 = vrot.slane %v125_v10, %v3127_v59 }
 0x25a   :  { %908 = vmatprep.subr.bf16.mxu1 %v2095_v2  ;;  %3121 = vst [vmem:[#allocation29_spill] sm:$0xff] %v2416_v31 }
 0x25b   :  { %v2418_v2 = vpop.f32.mrf.mxu1 }
 0x25c   :  { %3122 = vst [vmem:[#allocation30_spill] sm:$0xff] %v2418_v2 }
 0x25d   :  { %v2420_v56 = vpop.f32.mrf.mxu1 }
 0x25e   :  { %3123 = vst [vmem:[#allocation31_spill] sm:$0xff] %v2420_v56  ;;  %v247_v56 = vadd.f32 %v246_v23, %v2187_v30 }
 0x25f   :  { %v2425_v49 = vpop.f32.mrf.mxu1 }
 0x260   :  { %3124 = vst [vmem:[#allocation32_spill] sm:$0xff] %v2425_v49 }
 0x2dc   :  { %v622_v31 = vpop.f32.mrf.mxu0  ;;  %v694_v2 = vpop.f32.mrf.mxu1 }
 0x2dd   :  { %v640_v26 = vadd.f32 %v2429_v24, %v622_v31  ;;  %v701_v50 = vadd.f32 %v694_v2, %v245_v1 }
 0x2de   :  { %v624_v47 = vpop.f32.mrf.mxu0  ;;  %v696_v45 = vpop.f32.mrf.mxu1 }
 0x2df   :  { %v642_v49 = vmul.f32 0.5, %v640_v26  ;;  %v703_v44 = vmul.f32 0.5, %v701_v50  ;;  %v641_v34 = vadd.f32 %v2434_v62, %v624_v47  ;;  %v702_v43 = vadd.f32 %v696_v45, %v247_v56 }
 0x2e0   :  { %v626_v42 = vpop.f32.mrf.mxu0  ;;  %v698_v0 = vpop.f32.mrf.mxu1 }
 0x2e1   :  { %1826 = vtanh.f32 %v642_v49  ;;  %v646_v22 = vmul.f32 %v641_v34, %v2193_v36  ;;  %v707_v59 = vmul.f32 %v702_v43, %v2193_v36 }
 0x2e2   :  { %1828 = vtanh.f32 %v703_v44  ;;  %v627_v10 = vpop.f32.mrf.mxu0  ;;  %v699_v23 = vpop.f32.mrf.mxu1 }
 0x2e3   :  { %1830 = vtanh.f32 %v646_v22 }
 0x2e4   :  { %1832 = vtanh.f32 %v707_v59 }
 0x2ee   :  { %v1827_v1 = vpop.eup %1826 }
 0x2ef   :  { %v1829_v2 = vpop.eup %1828  ;;  %v644_v31 = vmul.f32 0.5, %v1827_v1 }
 0x2f0   :  { %v1831_v26 = vpop.eup %1830  ;;  %v705_v45 = vmul.f32 0.5, %v1829_v2 }
 0x2f1   :  { %v1833_v50 = vpop.eup %1832  ;;  %v648_v47 = vmul.f32 %v1831_v26, %v2193_v36  ;;  %v645_v56 = vadd.f32 0.5, %v644_v31 }
 0x2f2   :  { %v709_v42 = vmul.f32 %v1833_v50, %v2193_v36  ;;  %v706_v44 = vadd.f32 0.5, %v705_v45 }
 0x2f3   :  { %v649_v49 = vadd.f32 %v648_v47, %v2198_v46  ;;  %v651_v22 = vmul.f32 0.0, %v645_v56 }
 0x2f4   :  { %v710_v43 = vadd.f32 %v709_v42, %v2198_v46  ;;  %v712_v23 = vmul.f32 %v706_v44, %v2347_v48 }
 0x2f5   :  { %v650_v34 = vmul.f32 %v649_v49, %v645_v56 }
 0x2f6   :  { %v711_v0 = vmul.f32 %v710_v43, %v706_v44  ;;  %v3129_v44 = vld [vmem:[#allocation12_spill] sm:$0xff] }
 0x2f7   :  { %652 = vrot.lane.b32.xlu1 %v650_v34, %s2036_s2 }
 0x2fb   :  { %713 = vrot.lane.b32.xlu1 %v711_v0, %s2036_s2  ;;  %v3130_v0 = vld [vmem:[#allocation13_spill] sm:$0xff] }
 0x369   :  { %v653_v59 = vpop.permute.xlu1 %652 }
 0x36a   :  { %v654_v10 = vadd.f32 %v653_v59, %v651_v22  ;;  %v3131_v22 = vld [vmem:[#allocation14_spill] sm:$0xff]  ;;  %v3132_v59 = vld [vmem:[#allocation15_spill] sm:$0xff] }
 0x36c   :  { %1834 = vtanh.f32 %v654_v10 }
 0x36d   :  { %v714_v1 = vpop.permute.xlu1 %713 }
 0x36e   :  { %v715_v2 = vadd.f32 %v714_v1, %v712_v23  ;;  %v3134_v23 = vld [vmem:[#allocation17_spill] sm:$0xff]  ;;  %v3135_v1 = vld [vmem:[#allocation18_spill] sm:$0xff] }
 0x370   :  { %1836 = vtanh.f32 %v715_v2 }
 0x379   :  { %v1835_v31 = vpop.eup %1834 }
 0x37a   :  { %v656_v26 = vmul.f32 %v1835_v31, %v649_v49  ;;  %v3137_v31 = vld [vmem:[#allocation20_spill] sm:$0xff] }
 0x37c   :  { %657 = vrot.lane.b32.xlu0 %v656_v26, %s2036_s2  ;;  %v3138_v26 = vld [vmem:[#allocation9_spill] sm:$0xff] }
 0x37d   :  { %v1837_v50 = vpop.eup %1836 }
 0x37e   :  { %v717_v47 = vmul.f32 %v1837_v50, %v710_v43  ;;  %v3128_v43 = vmov 0   ;;  %v3139_v50 = vld [vmem:[#allocation21_spill] sm:$0xff] }
 0x380   :  { %718 = vrot.lane.b32.xlu1 %v717_v47, %s2036_s2  ;;  %v251_v47 = vadd.f32 %v3139_v50, %v2179_v25 }
 0x3ee   :  { %v658_v42 = vpop.permute.xlu0 %657 }
 0x3ef   :  { %v2452_v45 = vsel %vm73_vm1, %v658_v42, %v654_v10  ;;  %v3133_v10 = vld [vmem:[#allocation16_spill] sm:$0xff] }
 0x3f0   :  { %v722_v56 = vpack.c.bf16 %v2452_v45, %v2452_v45 }
 0x3f2   :  { %755 = vmatprep.mubr.bf16.mxu1 %v722_v56  ;;  %v719_v48 = vpop.permute.xlu1 %718 }
 0x3f3   :  { %v2458_v34 = vsel %vm73_vm1, %v719_v48, %v715_v2  ;;  %v3136_v2 = vld [vmem:[#allocation19_spill] sm:$0xff]  ;;  %v3140_v48 = vld [vmem:[#allocation22_spill] sm:$0xff] }
 0x3f4   :  { %v721_v49 = vpack.c.bf16 %v2458_v34, %v2458_v34 }
 0x3f6   :  { %756 = vmatmul.mubr.bf16.vlgmr.msra.gmra.mxu1 %v721_v49  ;;  %817 = vmatmul.mubr.bf16.vlgmr.msra.gmra.mxu0 %v721_v49  ;;  %v253_v49 = vadd.f32 %v3140_v48, %v2187_v30 }
 0x3f7   :  { %848 = vmatpush1.bf16.msra.mxu0 %v2211_v52  ;;  %909 = vmatpush1.bf16.msra.mxu1 %v2097_v3 }
 0x3f8   :  { %849 = vmatprep.subr.bf16.mxu0 %v2213_v53  ;;  %910 = vmatprep.subr.bf16.mxu1 %v2100_v4 }
 0x3f9   :  { %940 = vmatprep.mubr.bf16.mxu1 %v3128_v43 }
 0x3fb   :  { %850 = vmatpush1.bf16.msra.mxu0 %v2218_v54  ;;  %911 = vmatpush1.bf16.msra.mxu1 %v2103_v5 }
 0x3fc   :  { %851 = vmatprep.subr.bf16.mxu0 %v2221_v55  ;;  %912 = vmatprep.subr.bf16.mxu1 %v2106_v6 }
 0x3ff   :  { %852 = vmatpush1.bf16.msra.mxu0 %v2227_v57  ;;  %913 = vmatpush1.bf16.msra.mxu1 %v2109_v7 }
 0x400   :  { %853 = vmatprep.subr.bf16.mxu0 %v2231_v58  ;;  %914 = vmatprep.subr.bf16.mxu1 %v2112_v8 }
 0x403   :  { %854 = vmatpush1.bf16.msra.mxu0 %v2238_v60  ;;  %915 = vmatpush1.bf16.msra.mxu1 %v2124_v12 }
 0x404   :  { %855 = vmatprep.subr.bf16.mxu0 %v2242_v61  ;;  %916 = vmatprep.subr.bf16.mxu1 %v2126_v13 }
 0x407   :  { %856 = vmatpush1.bf16.msra.mxu0 %v2249_v63  ;;  %917 = vmatpush1.bf16.msra.mxu1 %v2130_v14 }
 0x408   :  { %857 = vmatprep.subr.bf16.mxu0 %v2253_v9  ;;  %918 = vmatprep.subr.bf16.mxu1 %v2134_v15 }
 0x40b   :  { %858 = vmatpush1.bf16.msra.mxu0 %v2260_v11  ;;  %919 = vmatpush1.bf16.msra.mxu1 %v2140_v16 }
 0x40c   :  { %859 = vmatprep.subr.bf16.mxu0 %v2264_v21  ;;  %920 = vmatprep.subr.bf16.mxu1 %v2142_v17 }
 0x40f   :  { %860 = vmatpush1.bf16.msra.mxu0 %v2271_v27  ;;  %921 = vmatpush1.bf16.msra.mxu1 %v2150_v18 }
 0x410   :  { %861 = vmatprep.subr.bf16.mxu0 %v2275_v29  ;;  %922 = vmatprep.subr.bf16.mxu1 %v2154_v19 }
 0x413   :  { %862 = vmatpush1.bf16.msra.mxu0 %v2282_v32  ;;  %923 = vmatpush1.bf16.msra.mxu1 %v2158_v20 }
 0x414   :  { %863 = vmatprep.subr.bf16.mxu0 %v2286_v33  ;;  %971 = vmatprep.subr.bf16.mxu1 %v2209_v51 }
 0x417   :  { %864 = vmatpush2.bf16.msra.mxu0 %v2293_v35 }
 0x418   :  { %865 = vmatprep.subr.bf16.mxu0 %v2297_v37 }
 0x41b   :  { %866 = vmatpush2.bf16.msra.mxu0 %v2301_v38 }
 0x41c   :  { %867 = vmatprep.subr.bf16.mxu0 %v2304_v39 }
 0x41f   :  { %868 = vmatpush2.bf16.msra.mxu0 %v2307_v40 }
 0x420   :  { %869 = vmatprep.subr.bf16.mxu0 %v2310_v41 }
 0x423   :  { %870 = vmatpush2.bf16.msra.mxu0 %v3129_v44 }
 0x424   :  { %871 = vmatprep.subr.bf16.mxu0 %v3130_v0 }
 0x427   :  { %872 = vmatpush2.bf16.msra.mxu0 %v3131_v22 }
 0x428   :  { %873 = vmatprep.subr.bf16.mxu0 %v3132_v59 }
 0x42b   :  { %874 = vmatpush2.bf16.msra.mxu0 %v3133_v10 }
 0x42c   :  { %875 = vmatprep.subr.bf16.mxu0 %v3134_v23 }
 0x42f   :  { %876 = vmatpush2.bf16.msra.mxu0 %v3135_v1 }
 0x430   :  { %877 = vmatprep.subr.bf16.mxu0 %v3136_v2 }
 0x433   :  { %878 = vmatpush2.bf16.msra.mxu0 %v3137_v31 }
 0x434   :  { %1032 = vmatprep.subr.bf16.mxu0 %v3138_v26 }
 0x4b6   :  { %v757_v42 = vpop.f32.mrf.mxu1  ;;  %v818_v56 = vpop.f32.mrf.mxu0 }
 0x4b7   :  { %v764_v10 = vadd.f32 %v757_v42, %v2429_v24  ;;  %v825_v59 = vadd.f32 %v818_v56, %v251_v47 }
 0x4b8   :  { %v759_v23 = vpop.f32.mrf.mxu1  ;;  %v820_v22 = vpop.f32.mrf.mxu0 }
 0x4b9   :  { %v766_v1 = vmul.f32 0.5, %v764_v10  ;;  %v827_v0 = vmul.f32 0.5, %v825_v59  ;;  %v765_v2 = vadd.f32 %v759_v23, %v2434_v62  ;;  %v826_v31 = vadd.f32 %v820_v22, %v253_v49 }
 0x4ba   :  { %v761_v44 = vpop.f32.mrf.mxu1  ;;  %v822_v26 = vpop.f32.mrf.mxu0 }
 0x4bb   :  { %1838 = vtanh.f32 %v766_v1  ;;  %v770_v50 = vmul.f32 %v765_v2, %v2193_v36  ;;  %v831_v25 = vmul.f32 %v826_v31, %v2193_v36 }
 0x4bc   :  { %1840 = vtanh.f32 %v827_v0  ;;  %v762_v41 = vpop.f32.mrf.mxu1  ;;  %v823_v48 = vpop.f32.mrf.mxu0 }
 0x4bd   :  { %1842 = vtanh.f32 %v770_v50 }
 0x4be   :  { %1844 = vtanh.f32 %v831_v25 }
 0x4c8   :  { %v1839_v47 = vpop.eup %1838 }
 0x4c9   :  { %v1841_v42 = vpop.eup %1840  ;;  %v768_v56 = vmul.f32 0.5, %v1839_v47 }
 0x4ca   :  { %v1843_v10 = vpop.eup %1842  ;;  %v829_v59 = vmul.f32 0.5, %v1841_v42 }
 0x4cb   :  { %v1845_v24 = vpop.eup %1844  ;;  %v772_v22 = vmul.f32 %v1843_v10, %v2193_v36  ;;  %v769_v23 = vadd.f32 0.5, %v768_v56 }
 0x4cc   :  { %v833_v44 = vmul.f32 %v1845_v24, %v2193_v36  ;;  %v830_v2 = vadd.f32 0.5, %v829_v59 }
 0x4cd   :  { %v773_v1 = vadd.f32 %v772_v22, %v2198_v46  ;;  %v775_v25 = vmul.f32 %v769_v23, %v2452_v45 }
 0x4ce   :  { %v834_v0 = vadd.f32 %v833_v44, %v2198_v46  ;;  %v836_v26 = vmul.f32 %v830_v2, %v2458_v34 }
 0x4cf   :  { %v774_v41 = vmul.f32 %v773_v1, %v769_v23 }
 0x4d0   :  { %v835_v31 = vmul.f32 %v834_v0, %v830_v2  ;;  %v3153_v2 = vld [vmem:[#allocation24_spill] sm:$0xff] }
 0x4d1   :  { %776 = vrot.lane.b32.xlu0 %v774_v41, %s2036_s2 }
 0x4d2   :  { %837 = vrot.lane.b32.xlu1 %v835_v31, %s2036_s2  ;;  %v3154_v31 = vld [vmem:[#allocation33_spill] sm:$0xff] }
 0x543   :  { %v777_v49 = vpop.permute.xlu0 %776 }
 0x544   :  { %v778_v50 = vadd.f32 %v777_v49, %v775_v25  ;;  %v838_v48 = vpop.permute.xlu1 %837 }
 0x545   :  { %v839_v24 = vadd.f32 %v838_v48, %v836_v26 }
 0x546   :  { %1846 = vtanh.f32 %v778_v50 }
 0x547   :  { %1848 = vtanh.f32 %v839_v24 }
 0x553   :  { %v1847_v47 = vpop.eup %1846 }
 0x554   :  { %v1849_v42 = vpop.eup %1848  ;;  %v780_v56 = vmul.f32 %v1847_v47, %v773_v1 }
 0x555   :  { %v841_v10 = vmul.f32 %v1849_v42, %v834_v0  ;;  %v259_v0 = vadd.f32 %v3153_v2, %v2187_v30 }
 0x556   :  { %781 = vrot.lane.b32.xlu0 %v780_v56, %s2036_s2 }
 0x557   :  { %842 = vrot.lane.b32.xlu1 %v841_v10, %s2036_s2 }
 0x5c8   :  { %v782_v59 = vpop.permute.xlu0 %781 }
 0x5c9   :  { %v2531_v45 = vsel %vm73_vm1, %v782_v59, %v778_v50  ;;  %v843_v22 = vpop.permute.xlu1 %842 }
 0x5ca   :  { %v846_v34 = vpack.c.bf16 %v2531_v45, %v2531_v45  ;;  %v2537_v44 = vsel %vm73_vm1, %v843_v22, %v839_v24 }
 0x5cb   :  { %v845_v23 = vpack.c.bf16 %v2537_v44, %v2537_v44 }
 0x5cc   :  { %879 = vmatprep.mubr.bf16.mxu0 %v846_v34 }
 0x5cd   :  { %941 = vmatmul.mubr.bf16.vlgmr.msra.gmra.mxu1 %v845_v23  ;;  %880 = vmatmul.mubr.bf16.vlgmr.msra.gmra.mxu0 %v845_v23 }
 0x5ce   :  { %972 = vmatpush1.bf16.msra.mxu1 %v2211_v52  ;;  %1033 = vmatpush1.bf16.msra.mxu0 %v2097_v3  ;;  %v3141_v3 = vld [vmem:[#allocation11_spill] sm:$0xff] }
 0x5cf   :  { %973 = vmatprep.subr.bf16.mxu1 %v2213_v53  ;;  %1034 = vmatprep.subr.bf16.mxu0 %v2100_v4  ;;  %v3142_v4 = vld [vmem:[#allocation12_spill] sm:$0xff] }
 0x5d0   :  { %1064 = vmatprep.mubr.bf16.mxu0 %v3128_v43 }
 0x5d2   :  { %974 = vmatpush1.bf16.msra.mxu1 %v2218_v54  ;;  %1035 = vmatpush1.bf16.msra.mxu0 %v2103_v5  ;;  %v3143_v5 = vld [vmem:[#allocation13_spill] sm:$0xff] }
 0x5d3   :  { %975 = vmatprep.subr.bf16.mxu1 %v2221_v55  ;;  %1036 = vmatprep.subr.bf16.mxu0 %v2106_v6  ;;  %v3144_v6 = vld [vmem:[#allocation14_spill] sm:$0xff] }
 0x5d6   :  { %976 = vmatpush1.bf16.msra.mxu1 %v2227_v57  ;;  %1037 = vmatpush1.bf16.msra.mxu0 %v2109_v7  ;;  %v3145_v7 = vld [vmem:[#allocation15_spill] sm:$0xff] }
 0x5d7   :  { %977 = vmatprep.subr.bf16.mxu1 %v2231_v58  ;;  %1038 = vmatprep.subr.bf16.mxu0 %v2112_v8  ;;  %v3146_v8 = vld [vmem:[#allocation16_spill] sm:$0xff] }
 0x5da   :  { %978 = vmatpush1.bf16.msra.mxu1 %v2238_v60  ;;  %1039 = vmatpush1.bf16.msra.mxu0 %v2124_v12  ;;  %v3147_v12 = vld [vmem:[#allocation17_spill] sm:$0xff] }
 0x5db   :  { %979 = vmatprep.subr.bf16.mxu1 %v2242_v61  ;;  %1040 = vmatprep.subr.bf16.mxu0 %v2126_v13  ;;  %v3148_v13 = vld [vmem:[#allocation18_spill] sm:$0xff] }
 0x5de   :  { %980 = vmatpush1.bf16.msra.mxu1 %v2249_v63  ;;  %1041 = vmatpush1.bf16.msra.mxu0 %v2130_v14  ;;  %v3149_v14 = vld [vmem:[#allocation19_spill] sm:$0xff] }
 0x5df   :  { %981 = vmatprep.subr.bf16.mxu1 %v2253_v9  ;;  %1042 = vmatprep.subr.bf16.mxu0 %v2134_v15  ;;  %v3150_v15 = vld [vmem:[#allocation20_spill] sm:$0xff] }
 0x5e2   :  { %982 = vmatpush1.bf16.msra.mxu1 %v2260_v11  ;;  %1043 = vmatpush1.bf16.msra.mxu0 %v2140_v16  ;;  %v2589_v16 = vld [vmem:[#allocation2 + $0x74] ss:$8 sps:$4 sm:$0xff]  }
 0x5e3   :  { %983 = vmatprep.subr.bf16.mxu1 %v2264_v21  ;;  %1044 = vmatprep.subr.bf16.mxu0 %v2142_v17  ;;  %v3151_v17 = vld [vmem:[#allocation10_spill] sm:$0xff] }
 0x5e6   :  { %984 = vmatpush1.bf16.msra.mxu1 %v2271_v27  ;;  %1045 = vmatpush1.bf16.msra.mxu0 %v2150_v18  ;;  %v3152_v18 = vld [vmem:[#allocation23_spill] sm:$0xff] }
 0x5e7   :  { %985 = vmatprep.subr.bf16.mxu1 %v2275_v29  ;;  %1046 = vmatprep.subr.bf16.mxu0 %v2154_v19  ;;  %v257_v19 = vadd.f32 %v3152_v18, %v3151_v17 }
 0x5ea   :  { %986 = vmatpush1.bf16.msra.mxu1 %v2282_v32  ;;  %1047 = vmatpush1.bf16.msra.mxu0 %v2158_v20 }
 0x5eb   :  { %987 = vmatprep.subr.bf16.mxu1 %v2286_v33  ;;  %1095 = vmatprep.subr.bf16.mxu0 %v2209_v51 }
 0x5ee   :  { %988 = vmatpush2.bf16.msra.mxu1 %v2293_v35 }
 0x5ef   :  { %989 = vmatprep.subr.bf16.mxu1 %v2297_v37 }
 0x5f2   :  { %990 = vmatpush2.bf16.msra.mxu1 %v2301_v38 }
 0x5f3   :  { %991 = vmatprep.subr.bf16.mxu1 %v2304_v39 }
 0x5f6   :  { %992 = vmatpush2.bf16.msra.mxu1 %v2307_v40 }
 0x5f7   :  { %993 = vmatprep.subr.bf16.mxu1 %v3141_v3 }
 0x5fa   :  { %994 = vmatpush2.bf16.msra.mxu1 %v3142_v4 }
 0x5fb   :  { %995 = vmatprep.subr.bf16.mxu1 %v3143_v5 }
 0x5fe   :  { %996 = vmatpush2.bf16.msra.mxu1 %v3144_v6 }
 0x5ff   :  { %997 = vmatprep.subr.bf16.mxu1 %v3145_v7 }
 0x602   :  { %998 = vmatpush2.bf16.msra.mxu1 %v3146_v8 }
 0x603   :  { %999 = vmatprep.subr.bf16.mxu1 %v3147_v12 }
 0x606   :  { %1000 = vmatpush2.bf16.msra.mxu1 %v3148_v13 }
 0x607   :  { %1001 = vmatprep.subr.bf16.mxu1 %v3149_v14 }
 0x60a   :  { %1002 = vmatpush2.bf16.msra.mxu1 %v3150_v15 }
 0x60b   :  { %1156 = vmatprep.subr.bf16.mxu1 %v2589_v16 }
 0x68d   :  { %v942_v20 = vpop.f32.mrf.mxu1  ;;  %v881_v1 = vpop.f32.mrf.mxu0 }
 0x68e   :  { %v949_v41 = vadd.f32 %v942_v20, %v257_v19  ;;  %v888_v25 = vadd.f32 %v881_v1, %v3154_v31 }
 0x68f   :  { %v944_v49 = vpop.f32.mrf.mxu1  ;;  %v883_v26 = vpop.f32.mrf.mxu0 }
 0x690   :  { %v951_v50 = vmul.f32 0.5, %v949_v41  ;;  %v890_v48 = vmul.f32 0.5, %v888_v25  ;;  %v950_v24 = vadd.f32 %v944_v49, %v259_v0  ;;  %v889_v47 = vadd.f32 %v883_v26, %v2434_v62 }
 0x691   :  { %v946_v42 = vpop.f32.mrf.mxu1  ;;  %v885_v56 = vpop.f32.mrf.mxu0 }
 0x692   :  { %1850 = vtanh.f32 %v951_v50  ;;  %v955_v10 = vmul.f32 %v950_v24, %v2193_v36  ;;  %v894_v59 = vmul.f32 %v889_v47, %v2193_v36 }
 0x693   :  { %1852 = vtanh.f32 %v890_v48  ;;  %v947_v22 = vpop.f32.mrf.mxu1  ;;  %v886_v34 = vpop.f32.mrf.mxu0 }
 0x694   :  { %1854 = vtanh.f32 %v955_v10 }
 0x695   :  { %1856 = vtanh.f32 %v894_v59 }
 0x69f   :  { %v1851_v23 = vpop.eup %1850 }
 0x6a0   :  { %v1853_v18 = vpop.eup %1852  ;;  %v953_v19 = vmul.f32 0.5, %v1851_v23 }
 0x6a1   :  { %v1855_v20 = vpop.eup %1854  ;;  %v892_v1 = vmul.f32 0.5, %v1853_v18 }
 0x6a2   :  { %v1857_v2 = vpop.eup %1856  ;;  %v957_v0 = vmul.f32 %v1855_v20, %v2193_v36  ;;  %v954_v25 = vadd.f32 0.5, %v953_v19 }
 0x6a3   :  { %v896_v41 = vmul.f32 %v1857_v2, %v2193_v36  ;;  %v893_v26 = vadd.f32 0.5, %v892_v1 }
 0x6a4   :  { %v958_v49 = vadd.f32 %v957_v0, %v2198_v46  ;;  %v960_v47 = vmul.f32 %v954_v25, %v2537_v44 }
 0x6a5   :  { %v897_v50 = vadd.f32 %v896_v41, %v2198_v46  ;;  %v899_v56 = vmul.f32 %v893_v26, %v2531_v45  ;;  %v2624_v41 = vld [vmem:[#allocation2 + $0x70] ss:$8 sps:$4 sm:$0xff]  }
 0x6a6   :  { %v959_v48 = vmul.f32 %v958_v49, %v954_v25  ;;  %v2628_v25 = vld [vmem:[#allocation2 + $0x64] ss:$8 sps:$4 sm:$0xff]  }
 0x6a7   :  { %v898_v24 = vmul.f32 %v897_v50, %v893_v26  ;;  %v2644_v26 = vld [vmem:[#allocation2 + $0x44] ss:$8 sps:$4 sm:$0xff]  }
 0x6a8   :  { %961 = vrot.lane.b32.xlu1 %v959_v48, %s2036_s2 }
 0x6a9   :  { %900 = vrot.lane.b32.xlu0 %v898_v24, %s2036_s2 }
 0x71a   :  { %v962_v42 = vpop.permute.xlu1 %961 }
 0x71b   :  { %v963_v10 = vadd.f32 %v962_v42, %v960_v47  ;;  %v901_v59 = vpop.permute.xlu0 %900 }
 0x71c   :  { %v902_v22 = vadd.f32 %v901_v59, %v899_v56 }
 0x71d   :  { %1858 = vtanh.f32 %v963_v10 }
 0x71e   :  { %1860 = vtanh.f32 %v902_v22 }
 0x72a   :  { %v1859_v34 = vpop.eup %1858 }
 0x72b   :  { %v1861_v23 = vpop.eup %1860  ;;  %v965_v18 = vmul.f32 %v1859_v34, %v958_v49  ;;  %v2633_v49 = vld [vmem:[#allocation2 + $0x60] ss:$8 sps:$4 sm:$0xff]  }
 0x72c   :  { %v904_v19 = vmul.f32 %v1861_v23, %v897_v50 }
 0x72d   :  { %966 = vrot.lane.b32.xlu1 %v965_v18, %s2036_s2 }
 0x72e   :  { %905 = vrot.lane.b32.xlu0 %v904_v19, %s2036_s2 }
 0x79f   :  { %v967_v20 = vpop.permute.xlu1 %966 }
 0x7a0   :  { %v2612_v44 = vsel %vm73_vm1, %v967_v20, %v963_v10  ;;  %v906_v1 = vpop.permute.xlu0 %905 }
 0x7a1   :  { %v969_v45 = vpack.c.bf16 %v2612_v44, %v2612_v44  ;;  %v2618_v2 = vsel %vm73_vm1, %v906_v1, %v902_v22 }
 0x7a2   :  { %v970_v0 = vpack.c.bf16 %v2618_v2, %v2618_v2 }
 0x7a3   :  { %1065 = vmatmul.mubr.bf16.vlgmr.msra.gmra.mxu0 %v969_v45 }
 0x7a4   :  { %1003 = vmatprep.mubr.bf16.mxu1 %v970_v0  ;;  %1096 = vmatpush1.bf16.msra.mxu0 %v2211_v52  ;;  %v2636_v52 = vld [vmem:[#allocation2 + $0x54] ss:$8 sps:$4 sm:$0xff]  }
 0x7a5   :  { %1004 = vmatmul.mubr.bf16.vlgmr.msra.gmra.mxu1 %v969_v45  ;;  %1097 = vmatprep.subr.bf16.mxu0 %v2213_v53  ;;  %v2641_v53 = vld [vmem:[#allocation2 + $0x50] ss:$8 sps:$4 sm:$0xff]  }
 0x7a6   :  { %1157 = vmatpush1.bf16.msra.mxu1 %v2624_v41  ;;  %1188 = vmatprep.mubr.bf16.mxu1 %v3128_v43 }
 0x7a7   :  { %1158 = vmatprep.subr.bf16.mxu1 %v2628_v25 }
 0x7a8   :  { %1098 = vmatpush1.bf16.msra.mxu0 %v2218_v54  ;;  %v2649_v54 = vld [vmem:[#allocation2 + $0x40] ss:$8 sps:$4 sm:$0xff]  }
 0x7a9   :  { %1099 = vmatprep.subr.bf16.mxu0 %v2221_v55  ;;  %v2652_v55 = vld [vmem:[#allocation2 + $0x34] ss:$8 sps:$4 sm:$0xff]  }
 0x7aa   :  { %1159 = vmatpush1.bf16.msra.mxu1 %v2633_v49 }
 0x7ab   :  { %1160 = vmatprep.subr.bf16.mxu1 %v2636_v52 }
 0x7ac   :  { %1100 = vmatpush1.bf16.msra.mxu0 %v2227_v57  ;;  %v2657_v57 = vld [vmem:[#allocation2 + $0x30] ss:$8 sps:$4 sm:$0xff]  }
 0x7ad   :  { %1101 = vmatprep.subr.bf16.mxu0 %v2231_v58  ;;  %v2660_v58 = vld [vmem:[#allocation2 + $0x24] ss:$8 sps:$4 sm:$0xff]  }
 0x7ae   :  { %1161 = vmatpush1.bf16.msra.mxu1 %v2641_v53 }
 0x7af   :  { %1162 = vmatprep.subr.bf16.mxu1 %v2644_v26 }
 0x7b0   :  { %1102 = vmatpush1.bf16.msra.mxu0 %v2238_v60  ;;  %v2665_v60 = vld [vmem:[#allocation2 + $0x20] ss:$8 sps:$4 sm:$0xff]  }
 0x7b1   :  { %1103 = vmatprep.subr.bf16.mxu0 %v2242_v61  ;;  %v2668_v61 = vld [vmem:[#allocation2 + $0x14] ss:$8 sps:$4 sm:$0xff]  }
 0x7b2   :  { %1163 = vmatpush1.bf16.msra.mxu1 %v2649_v54 }
 0x7b3   :  { %1164 = vmatprep.subr.bf16.mxu1 %v2652_v55 }
 0x7b4   :  { %1104 = vmatpush1.bf16.msra.mxu0 %v2249_v63  ;;  %v2673_v63 = vld [vmem:[#allocation2 + $0x10] ss:$8 sps:$4 sm:$0xff]  }
 0x7b5   :  { %1105 = vmatprep.subr.bf16.mxu0 %v2253_v9  ;;  %v2676_v9 = vld [vmem:[#allocation2 + $0x4] ss:$8 sps:$4 sm:$0xff]  }
 0x7b6   :  { %1165 = vmatpush1.bf16.msra.mxu1 %v2657_v57 }
 0x7b7   :  { %1166 = vmatprep.subr.bf16.mxu1 %v2660_v58 }
 0x7b8   :  { %1106 = vmatpush1.bf16.msra.mxu0 %v2260_v11  ;;  %v2681_v11 = vld [vmem:[#allocation2] ss:$8 sps:$4 sm:$0xff]  }
 0x7b9   :  { %1107 = vmatprep.subr.bf16.mxu0 %v2264_v21 }
 0x7ba   :  { %1167 = vmatpush1.bf16.msra.mxu1 %v2665_v60 }
 0x7bb   :  { %1168 = vmatprep.subr.bf16.mxu1 %v2668_v61 }
 0x7bc   :  { %1108 = vmatpush1.bf16.msra.mxu0 %v2271_v27 }
 0x7bd   :  { %1109 = vmatprep.subr.bf16.mxu0 %v2275_v29  ;;  %v3156_v29 = vld [vmem:[#allocation26_spill] sm:$0xff] }
 0x7be   :  { %1169 = vmatpush1.bf16.msra.mxu1 %v2673_v63 }
 0x7bf   :  { %1170 = vmatprep.subr.bf16.mxu1 %v2676_v9 }
 0x7c0   :  { %1110 = vmatpush1.bf16.msra.mxu0 %v2282_v32  ;;  %v265_v32 = vadd.f32 %v3156_v29, %v2187_v30 }
 0x7c1   :  { %1111 = vmatprep.subr.bf16.mxu0 %v2286_v33 }
 0x7c2   :  { %1171 = vmatpush1.bf16.msra.mxu1 %v2681_v11 }
 0x7c3   :  { %1219 = vmatprep.subr.bf16.mxu1 %v2209_v51  ;;  %v3155_v51 = vld [vmem:[#allocation25_spill] sm:$0xff] }
 0x7c4   :  { %1112 = vmatpush2.bf16.msra.mxu0 %v2293_v35  ;;  %v263_v21 = vadd.f32 %v3155_v51, %v3151_v17 }
 0x7c5   :  { %1113 = vmatprep.subr.bf16.mxu0 %v2297_v37 }
 0x7c8   :  { %1114 = vmatpush2.bf16.msra.mxu0 %v2301_v38 }
 0x7c9   :  { %1115 = vmatprep.subr.bf16.mxu0 %v2304_v39 }
 0x7cc   :  { %1116 = vmatpush2.bf16.msra.mxu0 %v2307_v40 }
 0x7cd   :  { %1117 = vmatprep.subr.bf16.mxu0 %v3141_v3 }
 0x7d0   :  { %1118 = vmatpush2.bf16.msra.mxu0 %v3142_v4 }
 0x7d1   :  { %1119 = vmatprep.subr.bf16.mxu0 %v3143_v5 }
 0x7d4   :  { %1120 = vmatpush2.bf16.msra.mxu0 %v3144_v6 }
 0x7d5   :  { %1121 = vmatprep.subr.bf16.mxu0 %v3145_v7 }
 0x7d8   :  { %1122 = vmatpush2.bf16.msra.mxu0 %v3146_v8 }
 0x7d9   :  { %1123 = vmatprep.subr.bf16.mxu0 %v3147_v12 }
 0x7dc   :  { %1124 = vmatpush2.bf16.msra.mxu0 %v3148_v13 }
 0x7dd   :  { %1125 = vmatprep.subr.bf16.mxu0 %v3149_v14 }
 0x7e0   :  { %1126 = vmatpush2.bf16.msra.mxu0 %v3150_v15 }
 0x7e1   :  { %1280 = vmatprep.subr.bf16.mxu0 %v2589_v16 }
 0x863   :  { %v1066_v27 = vpop.f32.mrf.mxu0 }
 0x864   :  { %v1073_v33 = vadd.f32 %v1066_v27, %v263_v21 }
 0x865   :  { %v1005_v35 = vpop.f32.mrf.mxu1  ;;  %v1068_v37 = vpop.f32.mrf.mxu0 }
 0x866   :  { %v1075_v38 = vmul.f32 0.5, %v1073_v33  ;;  %v1012_v39 = vadd.f32 %v1005_v35, %v3154_v31  ;;  %v1074_v40 = vadd.f32 %v1068_v37, %v265_v32 }
 0x867   :  { %v1007_v3 = vpop.f32.mrf.mxu1  ;;  %v1070_v4 = vpop.f32.mrf.mxu0 }
 0x868   :  { %1862 = vtanh.f32 %v1075_v38  ;;  %v1014_v5 = vmul.f32 0.5, %v1012_v39  ;;  %v1079_v6 = vmul.f32 %v1074_v40, %v2193_v36  ;;  %v1013_v7 = vadd.f32 %v1007_v3, %v2434_v62  ;;  %v2731_v40 = vld [vmem:[#allocation4 + $0x70] ss:$8 sps:$4 sm:$0xff]   ;;  %v2734_v3 = vld [vmem:[#allocation4 + $0x64] ss:$8 sps:$4 sm:$0xff]  }
 0x869   :  { %v1009_v8 = vpop.f32.mrf.mxu1  ;;  %v1071_v12 = vpop.f32.mrf.mxu0  ;;  %v2740_v4 = vld [vmem:[#allocation4 + $0x60] ss:$8 sps:$4 sm:$0xff]  }
 0x86a   :  { %1864 = vtanh.f32 %v1014_v5  ;;  %v1018_v13 = vmul.f32 %v1013_v7, %v2193_v36  ;;  %v2743_v5 = vld [vmem:[#allocation4 + $0x54] ss:$8 sps:$4 sm:$0xff]   ;;  %v2751_v7 = vld [vmem:[#allocation4 + $0x44] ss:$8 sps:$4 sm:$0xff]   ;;  %v2756_v8 = vld [vmem:[#allocation4 + $0x40] ss:$8 sps:$4 sm:$0xff]  }
 0x86b   :  { %1866 = vtanh.f32 %v1079_v6  ;;  %v1010_v14 = vpop.f32.mrf.mxu1  ;;  %v2748_v6 = vld [vmem:[#allocation4 + $0x50] ss:$8 sps:$4 sm:$0xff]   ;;  %v2759_v12 = vld [vmem:[#allocation4 + $0x34] ss:$8 sps:$4 sm:$0xff]  }
 0x86c   :  { %1868 = vtanh.f32 %v1018_v13  ;;  %v2764_v13 = vld [vmem:[#allocation4 + $0x30] ss:$8 sps:$4 sm:$0xff]   ;;  %v2767_v14 = vld [vmem:[#allocation4 + $0x24] ss:$8 sps:$4 sm:$0xff]  }
 0x875   :  { %v1863_v15 = vpop.eup %1862 }
 0x876   :  { %v1077_v48 = vmul.f32 0.5, %v1863_v15  ;;  %v2772_v15 = vld [vmem:[#allocation4 + $0x20] ss:$8 sps:$4 sm:$0xff]  }
 0x877   :  { %v1865_v50 = vpop.eup %1864 }
 0x878   :  { %v1867_v24 = vpop.eup %1866  ;;  %v1016_v47 = vmul.f32 0.5, %v1865_v50  ;;  %v1078_v59 = vadd.f32 0.5, %v1077_v48  ;;  %v2775_v50 = vld [vmem:[#allocation4 + $0x14] ss:$8 sps:$4 sm:$0xff]   ;;  %v2780_v48 = vld [vmem:[#allocation4 + $0x10] ss:$8 sps:$4 sm:$0xff]  }
 0x879   :  { %v1869_v42 = vpop.eup %1868  ;;  %v1081_v56 = vmul.f32 %v1867_v24, %v2193_v36  ;;  %v2783_v24 = vld [vmem:[#allocation4 + $0x4] ss:$8 sps:$4 sm:$0xff]  }
 0x87a   :  { %v1020_v10 = vmul.f32 %v1869_v42, %v2193_v36  ;;  %v1017_v34 = vadd.f32 0.5, %v1016_v47  ;;  %v1084_v20 = vmul.f32 %v1078_v59, %v2612_v44  ;;  %v2788_v47 = vld [vmem:[#allocation4] ss:$8 sps:$4 sm:$0xff]   ;;  %v2791_v42 = vld [vmem:[#allocation4 + $0xf4] ss:$8 sps:$4 sm:$0xff]  }
 0x87b   :  { %v1082_v22 = vadd.f32 %v1081_v56, %v2198_v46  ;;  %v2795_v56 = vld [vmem:[#allocation4 + $0x74] ss:$8 sps:$4 sm:$0xff]  }
 0x87c   :  { %v1021_v23 = vadd.f32 %v1020_v10, %v2198_v46  ;;  %v1023_v45 = vmul.f32 %v1017_v34, %v2618_v2  ;;  %v2798_v10 = vld [vmem:[#allocation4 + $0xf0] ss:$8 sps:$4 sm:$0xff]  }
 0x87d   :  { %v1083_v18 = vmul.f32 %v1082_v22, %v1078_v59  ;;  %v2801_v59 = vld [vmem:[#allocation4 + $0xe4] ss:$8 sps:$4 sm:$0xff]  }
 0x87e   :  { %v1022_v19 = vmul.f32 %v1021_v23, %v1017_v34  ;;  %v2807_v34 = vld [vmem:[#allocation4 + $0xd4] ss:$8 sps:$4 sm:$0xff]  }
 0x87f   :  { %1085 = vrot.lane.b32.xlu1 %v1083_v18, %s2036_s2  ;;  %v2813_v18 = vld [vmem:[#allocation4 + $0xc4] ss:$8 sps:$4 sm:$0xff]  }
 0x880   :  { %1024 = vrot.lane.b32.xlu0 %v1022_v19, %s2036_s2  ;;  %v2816_v19 = vld [vmem:[#allocation4 + $0xc0] ss:$8 sps:$4 sm:$0xff]  }
 0x881   :  { %3157 = vst [vmem:[#allocation9_spill] sm:$0xff] %v2816_v19 }
 0x8f1   :  { %v1086_v1 = vpop.permute.xlu1 %1085 }
 0x8f2   :  { %v1087_v0 = vadd.f32 %v1086_v1, %v1084_v20  ;;  %v1025_v51 = vpop.permute.xlu0 %1024  ;;  %v2819_v20 = vld [vmem:[#allocation4 + $0xb4] ss:$8 sps:$4 sm:$0xff]   ;;  %v2822_v1 = vld [vmem:[#allocation4 + $0xb0] ss:$8 sps:$4 sm:$0xff]  }
 0x8f3   :  { %v1026_v21 = vadd.f32 %v1025_v51, %v1023_v45  ;;  %3158 = vst [vmem:[#allocation21_spill] sm:$0xff] %v2819_v20  ;;  %3159 = vst [vmem:[#allocation22_spill] sm:$0xff] %v2822_v1  ;;  %v2825_v45 = vld [vmem:[#allocation4 + $0xa4] ss:$8 sps:$4 sm:$0xff]   ;;  %v2831_v51 = vld [vmem:[#allocation4 + $0x94] ss:$8 sps:$4 sm:$0xff]  }
 0x8f4   :  { %1870 = vtanh.f32 %v1087_v0  ;;  %3160 = vst [vmem:[#allocation11_spill] sm:$0xff] %v2825_v45  ;;  %3162 = vst [vmem:[#allocation13_spill] sm:$0xff] %v2831_v51 }
 0x8f5   :  { %1872 = vtanh.f32 %v1026_v21 }
 0x901   :  { %v1871_v27 = vpop.eup %1870 }
 0x902   :  { %v1873_v29 = vpop.eup %1872  ;;  %v1089_v32 = vmul.f32 %v1871_v27, %v1082_v22  ;;  %v2804_v22 = vld [vmem:[#allocation4 + $0xe0] ss:$8 sps:$4 sm:$0xff]   ;;  %v2837_v27 = vld [vmem:[#allocation4 + $0x84] ss:$8 sps:$4 sm:$0xff]  }
 0x903   :  { %v1028_v33 = vmul.f32 %v1873_v29, %v1021_v23  ;;  %v2810_v23 = vld [vmem:[#allocation4 + $0xd0] ss:$8 sps:$4 sm:$0xff]   ;;  %3164 = vst [vmem:[#allocation15_spill] sm:$0xff] %v2837_v27  ;;  %v2840_v29 = vld [vmem:[#allocation4 + $0x80] ss:$8 sps:$4 sm:$0xff]  }
 0x904   :  { %1090 = vrot.lane.b32.xlu1 %v1089_v32, %s2036_s2  ;;  %3165 = vst [vmem:[#allocation16_spill] sm:$0xff] %v2840_v29  ;;  %v3166_v32 = vld [vmem:[#allocation27_spill] sm:$0xff] }
 0x905   :  { %1029 = vrot.lane.b32.xlu0 %v1028_v33, %s2036_s2  ;;  %v269_v33 = vadd.f32 %v3166_v32, %v3151_v17 }
 0x976   :  { %v1091_v35 = vpop.permute.xlu1 %1090 }
 0x977   :  { %v2721_v44 = vsel %vm73_vm1, %v1091_v35, %v1087_v0  ;;  %v1030_v37 = vpop.permute.xlu0 %1029  ;;  %v2828_v0 = vld [vmem:[#allocation4 + $0xa0] ss:$8 sps:$4 sm:$0xff]  }
 0x978   :  { %v1093_v2 = vpack.c.bf16 %v2721_v44, %v2721_v44  ;;  %v2727_v38 = vsel %vm73_vm1, %v1030_v37, %v1026_v21  ;;  %3161 = vst [vmem:[#allocation12_spill] sm:$0xff] %v2828_v0  ;;  %v2834_v21 = vld [vmem:[#allocation4 + $0x90] ss:$8 sps:$4 sm:$0xff]  }
 0x979   :  { %v1094_v39 = vpack.c.bf16 %v2727_v38, %v2727_v38  ;;  %3163 = vst [vmem:[#allocation14_spill] sm:$0xff] %v2834_v21  ;;  %v3167_v37 = vld [vmem:[#allocation28_spill] sm:$0xff] }
 0x97a   :  { %1189 = vmatmul.mubr.bf16.vlgmr.msra.gmra.mxu1 %v1093_v2 }
 0x97b   :  { %1127 = vmatprep.mubr.bf16.mxu0 %v1094_v39  ;;  %1220 = vmatpush1.bf16.msra.mxu1 %v2731_v40 }
 0x97c   :  { %1128 = vmatmul.mubr.bf16.vlgmr.msra.gmra.mxu0 %v1093_v2  ;;  %1221 = vmatprep.subr.bf16.mxu1 %v2734_v3  ;;  %v271_v2 = vadd.f32 %v3167_v37, %v2187_v30 }
 0x97d   :  { %1281 = vmatpush1.bf16.msra.mxu0 %v2624_v41  ;;  %1312 = vmatprep.mubr.bf16.mxu0 %v3128_v43 }
 0x97e   :  { %1282 = vmatprep.subr.bf16.mxu0 %v2628_v25 }
 0x97f   :  { %1222 = vmatpush1.bf16.msra.mxu1 %v2740_v4 }
 0x980   :  { %1223 = vmatprep.subr.bf16.mxu1 %v2743_v5 }
 0x981   :  { %1283 = vmatpush1.bf16.msra.mxu0 %v2633_v49 }
 0x982   :  { %1284 = vmatprep.subr.bf16.mxu0 %v2636_v52 }
 0x983   :  { %1224 = vmatpush1.bf16.msra.mxu1 %v2748_v6 }
 0x984   :  { %1225 = vmatprep.subr.bf16.mxu1 %v2751_v7 }
 0x985   :  { %1285 = vmatpush1.bf16.msra.mxu0 %v2641_v53 }
 0x986   :  { %1286 = vmatprep.subr.bf16.mxu0 %v2644_v26 }
 0x987   :  { %1226 = vmatpush1.bf16.msra.mxu1 %v2756_v8 }
 0x988   :  { %1227 = vmatprep.subr.bf16.mxu1 %v2759_v12 }
 0x989   :  { %1287 = vmatpush1.bf16.msra.mxu0 %v2649_v54 }
 0x98a   :  { %1288 = vmatprep.subr.bf16.mxu0 %v2652_v55 }
 0x98b   :  { %1228 = vmatpush1.bf16.msra.mxu1 %v2764_v13 }
 0x98c   :  { %1229 = vmatprep.subr.bf16.mxu1 %v2767_v14 }
 0x98d   :  { %1289 = vmatpush1.bf16.msra.mxu0 %v2657_v57 }
 0x98e   :  { %1290 = vmatprep.subr.bf16.mxu0 %v2660_v58 }
 0x98f   :  { %1230 = vmatpush1.bf16.msra.mxu1 %v2772_v15 }
 0x990   :  { %1231 = vmatprep.subr.bf16.mxu1 %v2775_v50 }
 0x991   :  { %1291 = vmatpush1.bf16.msra.mxu0 %v2665_v60 }
 0x992   :  { %1292 = vmatprep.subr.bf16.mxu0 %v2668_v61 }
 0x993   :  { %1232 = vmatpush1.bf16.msra.mxu1 %v2780_v48 }
 0x994   :  { %1233 = vmatprep.subr.bf16.mxu1 %v2783_v24 }
 0x995   :  { %1293 = vmatpush1.bf16.msra.mxu0 %v2673_v63 }
 0x996   :  { %1294 = vmatprep.subr.bf16.mxu0 %v2676_v9 }
 0x997   :  { %1234 = vmatpush1.bf16.msra.mxu1 %v2788_v47 }
 0x998   :  { %1235 = vmatprep.subr.bf16.mxu1 %v2791_v42 }
 0x999   :  { %1295 = vmatpush1.bf16.msra.mxu0 %v2681_v11 }
 0x99a   :  { %1343 = vmatprep.subr.bf16.mxu0 %v2795_v56 }
 0x99b   :  { %1236 = vmatpush2.bf16.msra.mxu1 %v2798_v10 }
 0x99c   :  { %1237 = vmatprep.subr.bf16.mxu1 %v2801_v59 }
 0x99f   :  { %1238 = vmatpush2.bf16.msra.mxu1 %v2804_v22 }
 0x9a0   :  { %1239 = vmatprep.subr.bf16.mxu1 %v2807_v34 }
 0x9a3   :  { %1240 = vmatpush2.bf16.msra.mxu1 %v2810_v23 }
 0x9a4   :  { %1241 = vmatprep.subr.bf16.mxu1 %v2813_v18 }
 0x9a7   :  { %1242 = vmatpush2.bf16.msra.mxu1 %v2816_v19 }
 0x9a8   :  { %1243 = vmatprep.subr.bf16.mxu1 %v2819_v20 }
 0x9ab   :  { %1244 = vmatpush2.bf16.msra.mxu1 %v2822_v1 }
 0x9ac   :  { %1245 = vmatprep.subr.bf16.mxu1 %v2825_v45 }
 0x9af   :  { %1246 = vmatpush2.bf16.msra.mxu1 %v2828_v0 }
 0x9b0   :  { %1247 = vmatprep.subr.bf16.mxu1 %v2831_v51 }
 0x9b3   :  { %1248 = vmatpush2.bf16.msra.mxu1 %v2834_v21 }
 0x9b4   :  { %1249 = vmatprep.subr.bf16.mxu1 %v2837_v27 }
 0x9b7   :  { %1250 = vmatpush2.bf16.msra.mxu1 %v2840_v29 }
 0x9b8   :  { %1404 = vmatprep.subr.bf16.mxu1 %v2589_v16 }
 0xa3a   :  { %v1190_v35 = vpop.f32.mrf.mxu1 }
 0xa3b   :  { %v1197_v39 = vadd.f32 %v1190_v35, %v269_v33 }
 0xa3c   :  { %v1192_v51 = vpop.f32.mrf.mxu1  ;;  %v1129_v21 = vpop.f32.mrf.mxu0 }
 0xa3d   :  { %v1199_v0 = vmul.f32 0.5, %v1197_v39  ;;  %v1198_v45 = vadd.f32 %v1192_v51, %v271_v2  ;;  %v1136_v27 = vadd.f32 %v1129_v21, %v3154_v31 }
 0xa3e   :  { %v1194_v1 = vpop.f32.mrf.mxu1  ;;  %v1131_v20 = vpop.f32.mrf.mxu0 }
 0xa3f   :  { %1874 = vtanh.f32 %v1199_v0  ;;  %v1203_v29 = vmul.f32 %v1198_v45, %v2193_v36  ;;  %v1138_v16 = vmul.f32 0.5, %v1136_v27  ;;  %v1137_v19 = vadd.f32 %v1131_v20, %v2434_v62 }
 0xa40   :  { %v1195_v32 = vpop.f32.mrf.mxu1  ;;  %v1133_v17 = vpop.f32.mrf.mxu0 }
 0xa41   :  { %1876 = vtanh.f32 %v1203_v29  ;;  %v1142_v37 = vmul.f32 %v1137_v19, %v2193_v36 }
 0xa42   :  { %1878 = vtanh.f32 %v1138_v16  ;;  %v1134_v33 = vpop.f32.mrf.mxu0 }
 0xa43   :  { %1880 = vtanh.f32 %v1142_v37 }
 0xa4c   :  { %v1875_v35 = vpop.eup %1874 }
 0xa4d   :  { %v1201_v51 = vmul.f32 0.5, %v1875_v35 }
 0xa4e   :  { %v1877_v2 = vpop.eup %1876 }
 0xa4f   :  { %v1879_v21 = vpop.eup %1878  ;;  %v1205_v1 = vmul.f32 %v1877_v2, %v2193_v36  ;;  %v1202_v45 = vadd.f32 0.5, %v1201_v51 }
 0xa50   :  { %v1881_v0 = vpop.eup %1880  ;;  %v1140_v39 = vmul.f32 0.5, %v1879_v21 }
 0xa51   :  { %v1206_v27 = vadd.f32 %v1205_v1, %v2198_v46  ;;  %v1144_v20 = vmul.f32 %v1881_v0, %v2193_v36  ;;  %v1208_v32 = vmul.f32 %v1202_v45, %v2721_v44 }
 0xa52   :  { %v1141_v17 = vadd.f32 0.5, %v1140_v39 }
 0xa53   :  { %v1207_v29 = vmul.f32 %v1206_v27, %v1202_v45  ;;  %v1145_v19 = vadd.f32 %v1144_v20, %v2198_v46 }
 0xa54   :  { %v1147_v35 = vmul.f32 %v1141_v17, %v2727_v38 }
 0xa55   :  { %1209 = vrot.lane.b32.xlu1 %v1207_v29, %s2036_s2  ;;  %v1146_v16 = vmul.f32 %v1145_v19, %v1141_v17 }
 0xa57   :  { %1148 = vrot.lane.b32.xlu0 %v1146_v16, %s2036_s2 }
 0xac7   :  { %v1210_v37 = vpop.permute.xlu1 %1209 }
 0xac8   :  { %v1211_v33 = vadd.f32 %v1210_v37, %v1208_v32 }
 0xac9   :  { %v1149_v51 = vpop.permute.xlu0 %1148 }
 0xaca   :  { %1882 = vtanh.f32 %v1211_v33  ;;  %v1150_v2 = vadd.f32 %v1149_v51, %v1147_v35 }
 0xacc   :  { %1884 = vtanh.f32 %v1150_v2 }
 0xad7   :  { %v1883_v21 = vpop.eup %1882 }
 0xad8   :  { %v1213_v1 = vmul.f32 %v1883_v21, %v1206_v27 }
 0xad9   :  { %v1885_v0 = vpop.eup %1884 }
 0xada   :  { %1214 = vrot.lane.b32.xlu1 %v1213_v1, %s2036_s2  ;;  %v1152_v39 = vmul.f32 %v1885_v0, %v1145_v19 }
 0xadc   :  { %1153 = vrot.lane.b32.xlu0 %v1152_v39, %s2036_s2 }
 0xb4c   :  { %v1215_v20 = vpop.permute.xlu1 %1214 }
 0xb4d   :  { %v2864_v44 = vsel %vm73_vm1, %v1215_v20, %v1211_v33 }
 0xb4e   :  { %v1217_v38 = vpack.c.bf16 %v2864_v44, %v2864_v44  ;;  %v1154_v45 = vpop.permute.xlu0 %1153 }
 0xb4f   :  { %v2870_v17 = vsel %vm73_vm1, %v1154_v45, %v1150_v2 }
 0xb50   :  { %v1218_v27 = vpack.c.bf16 %v2870_v17, %v2870_v17  ;;  %1313 = vmatmul.mubr.bf16.vlgmr.msra.gmra.mxu0 %v1217_v38 }
 0xb51   :  { %1344 = vmatpush1.bf16.msra.mxu0 %v2731_v40 }
 0xb52   :  { %1251 = vmatprep.mubr.bf16.mxu1 %v1218_v27  ;;  %1345 = vmatprep.subr.bf16.mxu0 %v2734_v3 }
 0xb53   :  { %1252 = vmatmul.mubr.bf16.vlgmr.msra.gmra.mxu1 %v1217_v38 }
 0xb54   :  { %1405 = vmatpush1.bf16.msra.mxu1 %v2624_v41  ;;  %1436 = vmatprep.mubr.bf16.mxu1 %v3128_v43  ;;  %v3168_v43 = vld [vmem:[#allocation9_spill] sm:$0xff] }
 0xb55   :  { %1346 = vmatpush1.bf16.msra.mxu0 %v2740_v4  ;;  %1406 = vmatprep.subr.bf16.mxu1 %v2628_v25  ;;  %v3169_v41 = vld [vmem:[#allocation21_spill] sm:$0xff]  ;;  %v3170_v25 = vld [vmem:[#allocation22_spill] sm:$0xff] }
 0xb56   :  { %1347 = vmatprep.subr.bf16.mxu0 %v2743_v5 }
 0xb58   :  { %1407 = vmatpush1.bf16.msra.mxu1 %v2633_v49  ;;  %v3171_v49 = vld [vmem:[#allocation11_spill] sm:$0xff] }
 0xb59   :  { %1348 = vmatpush1.bf16.msra.mxu0 %v2748_v6  ;;  %1408 = vmatprep.subr.bf16.mxu1 %v2636_v52  ;;  %v3172_v52 = vld [vmem:[#allocation12_spill] sm:$0xff] }
 0xb5a   :  { %1349 = vmatprep.subr.bf16.mxu0 %v2751_v7 }
 0xb5c   :  { %1409 = vmatpush1.bf16.msra.mxu1 %v2641_v53  ;;  %v3173_v53 = vld [vmem:[#allocation13_spill] sm:$0xff] }
 0xb5d   :  { %1350 = vmatpush1.bf16.msra.mxu0 %v2756_v8  ;;  %1410 = vmatprep.subr.bf16.mxu1 %v2644_v26  ;;  %v3174_v26 = vld [vmem:[#allocation14_spill] sm:$0xff] }
 0xb5e   :  { %1351 = vmatprep.subr.bf16.mxu0 %v2759_v12 }
 0xb60   :  { %1411 = vmatpush1.bf16.msra.mxu1 %v2649_v54  ;;  %v3175_v54 = vld [vmem:[#allocation15_spill] sm:$0xff] }
 0xb61   :  { %1352 = vmatpush1.bf16.msra.mxu0 %v2764_v13  ;;  %1412 = vmatprep.subr.bf16.mxu1 %v2652_v55  ;;  %v3176_v55 = vld [vmem:[#allocation16_spill] sm:$0xff] }
 0xb62   :  { %1353 = vmatprep.subr.bf16.mxu0 %v2767_v14 }
 0xb64   :  { %1413 = vmatpush1.bf16.msra.mxu1 %v2657_v57  ;;  %v3177_v57 = vmov 0.0  }
 0xb65   :  { %1354 = vmatpush1.bf16.msra.mxu0 %v2772_v15  ;;  %1414 = vmatprep.subr.bf16.mxu1 %v2660_v58  ;;  %v3178_v58 = vld [vmem:[#allocation10_spill] sm:$0xff] }
 0xb66   :  { %1355 = vmatprep.subr.bf16.mxu0 %v2775_v50 }
 0xb68   :  { %1415 = vmatpush1.bf16.msra.mxu1 %v2665_v60  ;;  %v3179_v60 = vld [vmem:[#allocation29_spill] sm:$0xff] }
 0xb69   :  { %1356 = vmatpush1.bf16.msra.mxu0 %v2780_v48  ;;  %1416 = vmatprep.subr.bf16.mxu1 %v2668_v61  ;;  %v275_v61 = vadd.f32 %v3179_v60, %v3178_v58 }
 0xb6a   :  { %1357 = vmatprep.subr.bf16.mxu0 %v2783_v24 }
 0xb6c   :  { %1417 = vmatpush1.bf16.msra.mxu1 %v2673_v63 }
 0xb6d   :  { %1358 = vmatpush1.bf16.msra.mxu0 %v2788_v47  ;;  %1418 = vmatprep.subr.bf16.mxu1 %v2676_v9  ;;  %v3180_v9 = vld [vmem:[#allocation30_spill] sm:$0xff] }
 0xb6e   :  { %1359 = vmatprep.subr.bf16.mxu0 %v2791_v42 }
 0xb70   :  { %1419 = vmatpush1.bf16.msra.mxu1 %v2681_v11  ;;  %v277_v11 = vadd.f32 %v3180_v9, %v2187_v30 }
 0xb71   :  { %1360 = vmatpush2.bf16.msra.mxu0 %v2798_v10  ;;  %1467 = vmatprep.subr.bf16.mxu1 %v2795_v56 }
 0xb72   :  { %1361 = vmatprep.subr.bf16.mxu0 %v2801_v59 }
 0xb75   :  { %1362 = vmatpush2.bf16.msra.mxu0 %v2804_v22 }
 0xb76   :  { %1363 = vmatprep.subr.bf16.mxu0 %v2807_v34 }
 0xb79   :  { %1364 = vmatpush2.bf16.msra.mxu0 %v2810_v23 }
 0xb7a   :  { %1365 = vmatprep.subr.bf16.mxu0 %v2813_v18 }
 0xb7d   :  { %1366 = vmatpush2.bf16.msra.mxu0 %v3168_v43 }
 0xb7e   :  { %1367 = vmatprep.subr.bf16.mxu0 %v3169_v41 }
 0xb81   :  { %1368 = vmatpush2.bf16.msra.mxu0 %v3170_v25 }
 0xb82   :  { %1369 = vmatprep.subr.bf16.mxu0 %v3171_v49 }
 0xb85   :  { %1370 = vmatpush2.bf16.msra.mxu0 %v3172_v52 }
 0xb86   :  { %1371 = vmatprep.subr.bf16.mxu0 %v3173_v53 }
 0xb89   :  { %1372 = vmatpush2.bf16.msra.mxu0 %v3174_v26 }
 0xb8a   :  { %1373 = vmatprep.subr.bf16.mxu0 %v3175_v54 }
 0xb8d   :  { %1374 = vmatpush2.bf16.msra.mxu0 %v3176_v55 }
 0xb8e   :  { %1702 = vmatprep.subr.mxu0 %v3177_v57 }
 0xc10   :  { %v1314_v63 = vpop.f32.mrf.mxu0 }
 0xc11   :  { %v1321_v56 = vadd.f32 %v1314_v63, %v275_v61 }
 0xc12   :  { %v1316_v29 = vpop.f32.mrf.mxu0 }
 0xc13   :  { %v1323_v19 = vmul.f32 0.5, %v1321_v56  ;;  %v1322_v16 = vadd.f32 %v1316_v29, %v277_v11  ;;  %v1253_v32 = vpop.f32.mrf.mxu1 }
 0xc14   :  { %v1260_v37 = vadd.f32 %v1253_v32, %v3154_v31  ;;  %v1318_v33 = vpop.f32.mrf.mxu0 }
 0xc15   :  { %1886 = vtanh.f32 %v1323_v19  ;;  %v1327_v35 = vmul.f32 %v1322_v16, %v2193_v36  ;;  %v1255_v51 = vpop.f32.mrf.mxu1 }
 0xc16   :  { %v1262_v2 = vmul.f32 0.5, %v1260_v37  ;;  %v1261_v21 = vadd.f32 %v1255_v51, %v2434_v62  ;;  %v1319_v1 = vpop.f32.mrf.mxu0 }
 0xc17   :  { %1888 = vtanh.f32 %v1327_v35  ;;  %v1257_v0 = vpop.f32.mrf.mxu1 }
 0xc18   :  { %1890 = vtanh.f32 %v1262_v2  ;;  %v1266_v39 = vmul.f32 %v1261_v21, %v2193_v36 }
 0xc19   :  { %v1258_v20 = vpop.f32.mrf.mxu1 }
 0xc1a   :  { %1892 = vtanh.f32 %v1266_v39 }
 0xc22   :  { %v1887_v38 = vpop.eup %1886 }
 0xc23   :  { %v1325_v45 = vmul.f32 0.5, %v1887_v38 }
 0xc24   :  { %v1889_v27 = vpop.eup %1888 }
 0xc25   :  { %v1891_v60 = vpop.eup %1890  ;;  %v1329_v61 = vmul.f32 %v1889_v27, %v2193_v36  ;;  %v1326_v11 = vadd.f32 0.5, %v1325_v45 }
 0xc26   :  { %v1264_v63 = vmul.f32 0.5, %v1891_v60 }
 0xc27   :  { %v1893_v9 = vpop.eup %1892  ;;  %v1330_v56 = vadd.f32 %v1329_v61, %v2198_v46  ;;  %v1332_v33 = vmul.f32 %v1326_v11, %v2864_v44 }
 0xc28   :  { %v1268_v29 = vmul.f32 %v1893_v9, %v2193_v36  ;;  %v1265_v16 = vadd.f32 0.5, %v1264_v63 }
 0xc29   :  { %v1331_v19 = vmul.f32 %v1330_v56, %v1326_v11 }
 0xc2a   :  { %v1269_v32 = vadd.f32 %v1268_v29, %v2198_v46  ;;  %v1271_v2 = vmul.f32 %v1265_v16, %v2870_v17 }
 0xc2b   :  { %1333 = vrot.lane.b32.xlu1 %v1331_v19, %s2036_s2 }
 0xc2c   :  { %v1270_v37 = vmul.f32 %v1269_v32, %v1265_v16 }
 0xc2e   :  { %1272 = vrot.lane.b32.xlu0 %v1270_v37, %s2036_s2 }
 0xc9d   :  { %v1334_v35 = vpop.permute.xlu1 %1333 }
 0xc9e   :  { %v1335_v51 = vadd.f32 %v1334_v35, %v1332_v33 }
 0xca0   :  { %1894 = vtanh.f32 %v1335_v51  ;;  %v1273_v21 = vpop.permute.xlu0 %1272 }
 0xca1   :  { %v1274_v1 = vadd.f32 %v1273_v21, %v1271_v2 }
 0xca3   :  { %1896 = vtanh.f32 %v1274_v1 }
 0xcad   :  { %v1895_v0 = vpop.eup %1894 }
 0xcae   :  { %v1337_v39 = vmul.f32 %v1895_v0, %v1330_v56 }
 0xcb0   :  { %v1897_v20 = vpop.eup %1896  ;;  %1338 = vrot.lane.b32.xlu1 %v1337_v39, %s2036_s2 }
 0xcb1   :  { %v1276_v38 = vmul.f32 %v1897_v20, %v1269_v32 }
 0xcb3   :  { %1277 = vrot.lane.b32.xlu0 %v1276_v38, %s2036_s2 }
 0xd22   :  { %v1339_v45 = vpop.permute.xlu1 %1338 }
 0xd23   :  { %v2943_v44 = vsel %vm73_vm1, %v1339_v45, %v1335_v51 }
 0xd24   :  { %v1341_v17 = vpack.c.bf16 %v2943_v44, %v2943_v44 }
 0xd25   :  { %v1278_v27 = vpop.permute.xlu0 %1277 }
 0xd26   :  { %v2949_v60 = vsel %vm73_vm1, %v1278_v27, %v1274_v1  ;;  %1437 = vmatmul.mubr.bf16.vlgmr.msra.gmra.mxu1 %v1341_v17 }
 0xd27   :  { %v1342_v61 = vpack.c.bf16 %v2949_v60, %v2949_v60  ;;  %1468 = vmatpush1.bf16.msra.mxu1 %v2731_v40  ;;  %v3181_v40 = vld [vmem:[#allocation31_spill] sm:$0xff] }
 0xd28   :  { %1469 = vmatprep.subr.bf16.mxu1 %v2734_v3  ;;  %v281_v3 = vadd.f32 %v3181_v40, %v3178_v58 }
 0xd29   :  { %1375 = vmatprep.mubr.bf16.mxu0 %v1342_v61 }
 0xd2a   :  { %1376 = vmatmul.mubr.bf16.vlgmr.msra.gmra.mxu0 %v1341_v17 }
 0xd2b   :  { %1470 = vmatpush1.bf16.msra.mxu1 %v2740_v4  ;;  %1734 = vmatprep.mubr.msk.f32.mxu0 %vm2038_vm2, %v3177_v57 }
 0xd2c   :  { %1471 = vmatprep.subr.bf16.mxu1 %v2743_v5  ;;  %v3182_v5 = vld [vmem:[#allocation32_spill] sm:$0xff] }
 0xd2f   :  { %1472 = vmatpush1.bf16.msra.mxu1 %v2748_v6  ;;  %v283_v6 = vadd.f32 %v3182_v5, %v2187_v30 }
 0xd30   :  { %1473 = vmatprep.subr.bf16.mxu1 %v2751_v7 }
 0xd33   :  { %1474 = vmatpush1.bf16.msra.mxu1 %v2756_v8 }
 0xd34   :  { %1475 = vmatprep.subr.bf16.mxu1 %v2759_v12 }
 0xd37   :  { %1476 = vmatpush1.bf16.msra.mxu1 %v2764_v13 }
 0xd38   :  { %1477 = vmatprep.subr.bf16.mxu1 %v2767_v14 }
 0xd3b   :  { %1478 = vmatpush1.bf16.msra.mxu1 %v2772_v15 }
 0xd3c   :  { %1479 = vmatprep.subr.bf16.mxu1 %v2775_v50 }
 0xd3f   :  { %1480 = vmatpush1.bf16.msra.mxu1 %v2780_v48 }
 0xd40   :  { %1481 = vmatprep.subr.bf16.mxu1 %v2783_v24 }
 0xd43   :  { %1482 = vmatpush1.bf16.msra.mxu1 %v2788_v47 }
 0xd44   :  { %1483 = vmatprep.subr.bf16.mxu1 %v2791_v42 }
 0xd47   :  { %1484 = vmatpush2.bf16.msra.mxu1 %v2798_v10 }
 0xd48   :  { %1485 = vmatprep.subr.bf16.mxu1 %v2801_v59 }
 0xd4b   :  { %1486 = vmatpush2.bf16.msra.mxu1 %v2804_v22 }
 0xd4c   :  { %1487 = vmatprep.subr.bf16.mxu1 %v2807_v34 }
 0xd4f   :  { %1488 = vmatpush2.bf16.msra.mxu1 %v2810_v23 }
 0xd50   :  { %1489 = vmatprep.subr.bf16.mxu1 %v2813_v18 }
 0xd53   :  { %1490 = vmatpush2.bf16.msra.mxu1 %v3168_v43 }
 0xd54   :  { %1491 = vmatprep.subr.bf16.mxu1 %v3169_v41 }
 0xd57   :  { %1492 = vmatpush2.bf16.msra.mxu1 %v3170_v25 }
 0xd58   :  { %1493 = vmatprep.subr.bf16.mxu1 %v3171_v49 }
 0xd5b   :  { %1494 = vmatpush2.bf16.msra.mxu1 %v3172_v52 }
 0xd5c   :  { %1495 = vmatprep.subr.bf16.mxu1 %v3173_v53 }
 0xd5f   :  { %1496 = vmatpush2.bf16.msra.mxu1 %v3174_v26 }
 0xd60   :  { %1497 = vmatprep.subr.bf16.mxu1 %v3175_v54 }
 0xd63   :  { %1498 = vmatpush2.bf16.msra.mxu1 %v3176_v55 }
 0xde6   :  { %v1438_v4 = vpop.f32.mrf.mxu1 }
 0xde7   :  { %v1445_v7 = vadd.f32 %v1438_v4, %v281_v3 }
 0xde8   :  { %v1440_v8 = vpop.f32.mrf.mxu1 }
 0xde9   :  { %v1447_v12 = vmul.f32 0.5, %v1445_v7  ;;  %v1446_v13 = vadd.f32 %v1440_v8, %v283_v6 }
 0xdea   :  { %v1442_v14 = vpop.f32.mrf.mxu1  ;;  %v1377_v15 = vpop.f32.mrf.mxu0 }
 0xdeb   :  { %1898 = vtanh.f32 %v1447_v12  ;;  %v1451_v50 = vmul.f32 %v1446_v13, %v2193_v36  ;;  %v1384_v48 = vadd.f32 %v1377_v15, %v3154_v31  ;;  %v1542_v12 = vld [vmem:[#allocation6 + $0x70] sm:$0xff]  ;;  %v1540_v13 = vld [vmem:[#allocation6 + $0x60] sm:$0xff]  ;;  %v1537_v14 = vld [vmem:[#allocation6 + $0x48] sm:$0xff] }
 0xdec   :  { %v1443_v24 = vpop.f32.mrf.mxu1  ;;  %v1379_v47 = vpop.f32.mrf.mxu0  ;;  %v1536_v15 = vld [vmem:[#allocation6 + $0x40] sm:$0xff] }
 0xded   :  { %1900 = vtanh.f32 %v1451_v50  ;;  %v1386_v42 = vmul.f32 0.5, %v1384_v48  ;;  %v1385_v10 = vadd.f32 %v1379_v47, %v2434_v62  ;;  %v1535_v50 = vld [vmem:[#allocation6 + $0x38] sm:$0xff]  ;;  %v1534_v48 = vld [vmem:[#allocation6 + $0x30] sm:$0xff]  ;;  %v1533_v24 = vld [vmem:[#allocation6 + $0x28] sm:$0xff] }
 0xdee   :  { %v1381_v59 = vpop.f32.mrf.mxu0  ;;  %v1532_v47 = vld [vmem:[#allocation6 + $0x20] sm:$0xff] }
 0xdef   :  { %1902 = vtanh.f32 %v1386_v42  ;;  %v1390_v30 = vmul.f32 %v1385_v10, %v2193_v36  ;;  %v1531_v42 = vld [vmem:[#allocation6 + $0x18] sm:$0xff]  ;;  %v1530_v10 = vld [vmem:[#allocation6 + $0x10] sm:$0xff]  ;;  %v1529_v59 = vld [vmem:[#allocation6 + $0x8] sm:$0xff] }
 0xdf0   :  { %v1382_v22 = vpop.f32.mrf.mxu0 }
 0xdf1   :  { %1904 = vtanh.f32 %v1390_v30 }
 0xdf8   :  { %v1899_v34 = vpop.eup %1898 }
 0xdf9   :  { %v1449_v23 = vmul.f32 0.5, %v1899_v34 }
 0xdfa   :  { %v1901_v18 = vpop.eup %1900 }
 0xdfb   :  { %v1453_v43 = vmul.f32 %v1901_v18, %v2193_v36  ;;  %v1450_v25 = vadd.f32 0.5, %v1449_v23  ;;  %v1528_v23 = vld [vmem:[#allocation6] sm:$0xff] }
 0xdfc   :  { %v1903_v41 = vpop.eup %1902 }
 0xdfd   :  { %v1388_v49 = vmul.f32 0.5, %v1903_v41  ;;  %v1454_v52 = vadd.f32 %v1453_v43, %v2198_v46  ;;  %v1456_v9 = vmul.f32 %v1450_v25, %v2943_v44 }
 0xdfe   :  { %v1905_v53 = vpop.eup %1904 }
 0xdff   :  { %v1455_v26 = vmul.f32 %v1454_v52, %v1450_v25  ;;  %v1392_v54 = vmul.f32 %v1905_v53, %v2193_v36  ;;  %v1389_v55 = vadd.f32 0.5, %v1388_v49  ;;  %v1684_v49 = vld [vmem:[%s3049_s7] ss:$0 sm:$0xff] }
 0xe01   :  { %1457 = vrot.lane.b32.xlu1 %v1455_v26, %s2036_s2  ;;  %v1393_v58 = vadd.f32 %v1392_v54, %v2198_v46  ;;  %v1395_v29 = vmul.f32 %v1389_v55, %v2949_v60 }
 0xe03   :  { %v1394_v63 = vmul.f32 %v1393_v58, %v1389_v55 }
 0xe05   :  { %1396 = vrot.lane.b32.xlu0 %v1394_v63, %s2036_s2 }
 0xe73   :  { %v1458_v11 = vpop.permute.xlu1 %1457 }
 0xe74   :  { %v1459_v56 = vadd.f32 %v1458_v11, %v1456_v9 }
 0xe76   :  { %1906 = vtanh.f32 %v1459_v56 }
 0xe77   :  { %v1397_v19 = vpop.permute.xlu0 %1396 }
 0xe78   :  { %v1398_v16 = vadd.f32 %v1397_v19, %v1395_v29 }
 0xe7a   :  { %1908 = vtanh.f32 %v1398_v16 }
 0xe83   :  { %v1907_v32 = vpop.eup %1906 }
 0xe84   :  { %v1461_v37 = vmul.f32 %v1907_v32, %v1454_v52 }
 0xe86   :  { %1462 = vrot.lane.b32.xlu1 %v1461_v37, %s2036_s2 }
 0xe87   :  { %v1909_v33 = vpop.eup %1908 }
 0xe88   :  { %v1400_v35 = vmul.f32 %v1909_v33, %v1393_v58 }
 0xe8a   :  { %1401 = vrot.lane.b32.xlu0 %v1400_v35, %s2036_s2 }
 0xef8   :  { %v1463_v51 = vpop.permute.xlu1 %1462 }
 0xef9   :  { %v1464_v2 = vsel %vm73_vm1, %v1463_v51, %v1459_v56 }
 0xefa   :  { %v1465_v39 = vpack.c.bf16 %v1464_v2, %v1464_v2 }
 0xefc   :  { %v1402_v21 = vpop.permute.xlu0 %1401 }
 0xefd   :  { %v3006_v1 = vsel %vm73_vm1, %v1402_v21, %v1398_v16 }
 0xefe   :  { %v1466_v0 = vpack.c.bf16 %v3006_v1, %v3006_v1 }
 0xf00   :  { %1499 = vmatprep.mubr.bf16.mxu1 %v1466_v0 }
 0xf01   :  { %1500 = vmatmul.mubr.bf16.vlgmr.msra.gmra.mxu1 %v1465_v39 }
 0xfc1   :  { %v1501_v20 = vpop.f32.mrf.mxu1 }
 0xfc2   :  { %v1508_v38 = vadd.f32 %v1501_v20, %v3154_v31  ;;  %v1543_v31 = vld [vmem:[#allocation6 + $0x78] sm:$0xff] }
 0xfc3   :  { %v1503_v45 = vpop.f32.mrf.mxu1  ;;  %1703 = vmatpush3.msra.mxu0 %v1543_v31 }
 0xfc4   :  { %v1510_v44 = vmul.f32 0.5, %v1508_v38  ;;  %v1509_v17 = vadd.f32 %v1503_v45, %v2434_v62  ;;  %1704 = vmatprep.subr.mxu0 %v3177_v57  ;;  %v1541_v62 = vld [vmem:[#allocation6 + $0x68] sm:$0xff] }
 0xfc5   :  { %v1505_v27 = vpop.f32.mrf.mxu1  ;;  %1705 = vmatpush3.msra.mxu0 %v1542_v12 }
 0xfc6   :  { %1910 = vtanh.f32 %v1510_v44  ;;  %v1514_v60 = vmul.f32 %v1509_v17, %v2193_v36  ;;  %1706 = vmatprep.subr.mxu0 %v3177_v57 }
 0xfc7   :  { %v1506_v61 = vpop.f32.mrf.mxu1  ;;  %1707 = vmatpush3.msra.mxu0 %v1541_v62 }
 0xfc8   :  { %1912 = vtanh.f32 %v1514_v60  ;;  %1708 = vmatprep.subr.mxu0 %v3177_v57 }
 0xfc9   :  { %1709 = vmatpush3.msra.mxu0 %v1540_v13 }
 0xfca   :  { %1710 = vmatprep.subr.mxu0 %v3177_v57 }
 0xfd3   :  { %v1911_v40 = vpop.eup %1910 }
 0xfd4   :  { %v1512_v3 = vmul.f32 0.5, %v1911_v40 }
 0xfd5   :  { %v1913_v4 = vpop.eup %1912 }
 0xfd6   :  { %v1516_v5 = vmul.f32 %v1913_v4, %v2193_v36  ;;  %v1513_v6 = vadd.f32 0.5, %v1512_v3  ;;  %v1539_v36 = vld [vmem:[#allocation6 + $0x58] sm:$0xff] }
 0xfd7   :  { %1711 = vmatpush3.msra.mxu0 %v1539_v36 }
 0xfd8   :  { %v1517_v7 = vadd.f32 %v1516_v5, %v2198_v46  ;;  %v1538_v46 = vld [vmem:[#allocation6 + $0x50] sm:$0xff]  ;;  %1712 = vmatprep.subr.mxu0 %v3177_v57  ;;  %v1519_v30 = vmul.f32 %v1513_v6, %v3006_v1 }
 0xfd9   :  { %1713 = vmatpush3.msra.mxu0 %v1538_v46 }
 0xfda   :  { %v1518_v8 = vmul.f32 %v1517_v7, %v1513_v6  ;;  %1714 = vmatprep.subr.mxu0 %v3177_v57 }
 0xfdb   :  { %1715 = vmatpush3.msra.mxu0 %v1537_v14 }
 0xfdc   :  { %1520 = vrot.lane.b32.xlu0 %v1518_v8, %s2036_s2  ;;  %1716 = vmatprep.subr.mxu0 %v3177_v57 }
 0xfdd   :  { %1717 = vmatpush3.msra.mxu0 %v1536_v15 }
 0xfde   :  { %1718 = vmatprep.subr.mxu0 %v3177_v57 }
 0xfdf   :  { %1719 = vmatpush3.msra.mxu0 %v1535_v50 }
 0xfe0   :  { %1720 = vmatprep.subr.mxu0 %v3177_v57 }
 0xfe1   :  { %1721 = vmatpush3.msra.mxu0 %v1534_v48 }
 0xfe2   :  { %1722 = vmatprep.subr.mxu0 %v3177_v57 }
 0xfe3   :  { %1723 = vmatpush3.msra.mxu0 %v1533_v24 }
 0xfe4   :  { %1724 = vmatprep.subr.mxu0 %v3177_v57 }
 0xfe5   :  { %1725 = vmatpush3.msra.mxu0 %v1532_v47 }
 0xfe6   :  { %1726 = vmatprep.subr.mxu0 %v3177_v57 }
 0xfe7   :  { %1727 = vmatpush3.msra.mxu0 %v1531_v42 }
 0xfe8   :  { %1728 = vmatprep.subr.mxu0 %v3177_v57 }
 0xfe9   :  { %1729 = vmatpush3.msra.mxu0 %v1530_v10 }
 0xfea   :  { %1730 = vmatprep.subr.mxu0 %v3177_v57 }
 0xfeb   :  { %1731 = vmatpush3.msra.mxu0 %v1529_v59 }
 0xfec   :  { %1732 = vmatprep.subr.mxu0 %v3177_v57 }
 0xfed   :  { %1733 = vmatpush3.msra.mxu0 %v1528_v23 }
0x104e   :  { %v1521_v22 = vpop.permute.xlu0 %1520 }
0x104f   :  { %v1522_v34 = vadd.f32 %v1521_v22, %v1519_v30 }
0x1051   :  { %1914 = vtanh.f32 %v1522_v34 }
0x105e   :  { %v1915_v18 = vpop.eup %1914 }
0x105f   :  { %v1524_v43 = vmul.f32 %v1915_v18, %v1517_v7 }
0x1061   :  { %1525 = vrot.lane.b32.xlu1 %v1524_v43, %s2036_s2 }
0x10d3   :  { %v1526_v41 = vpop.permute.xlu1 %1525 }
0x10d4   :  { %v1527_v25 = vsel %vm73_vm1, %v1526_v41, %v1522_v34 }
0x10d5   :  { %1735 = vmatmul.mubr.f32.vlgmr.msra.gmra.mxu0 %v1527_v25 }
0x1195   :  { %v1617_v52 = vpop.f32.mrf.mxu0 }
0x1196   :  { %v1618_v53 = vadd.f32 %v1684_v49, %v1617_v52 }
0x1197   :  { %v1736_v26 = vpop.f32.mrf.mxu0 }
0x1198   :  { %1621 = vst [vmem:[%s3050_s8] sm:$0xff] %v1618_v53 }
0x1199   :  { %1626 = vsyncpa [#allocation3], 1 }
0x119a   :  { %1627 = vsyncpa [#allocation5], 1 }

</bundles_post_ra>
